<compile_context>
chip_gen: v6e
topology: v6e:2x2x1
jax: 0.10.0
libtpu: 0.0.40
codegen_flags: <defaults>
</compile_context>

<pallas_src>
import math
import functools

import numpy as np
import jax
import jax.numpy as jnp
from jax.experimental import pallas as pl
from jax.experimental.pallas import tpu as pltpu


# ------------------------------ fused kernel --------------------------------

def _forward_kernel(oh_ref, embin_w_ref, embin_b_ref,
                    sel_ref, pw_ref, clspe_ref, pbpe_ref,
                    cos_ref, sin_ref, rot_ref, msk_ref,
                    wqkv_ref, bqkv_ref, wo_ref, bo_ref,
                    n1g_ref, n1b_ref, ff1w_ref, ff1b_ref, ff2w_ref, ff2b_ref,
                    n2g_ref, n2b_ref, ng_ref, nb_ref, ow_ref, ob_ref,
                    o_ref,
                    *, n_layers, patch_size, seq_len, d_model, ln_eps, attn_eps):
    f32 = jnp.float32

    def layernorm(x, g, b):
        mu = jnp.mean(x, axis=-1, keepdims=True)
        xc = x - mu
        var = jnp.mean(xc * xc, axis=-1, keepdims=True)
        return xc * jax.lax.rsqrt(var + ln_eps) * g + b

    def elu1(x):
        return jnp.where(x > 0, x, jnp.exp(jnp.minimum(x, 0.0)) - 1.0) + 1.0

    # ---- one-hot @ (block-diag CPLinear ∘ in_linear), sqrt(E) baked in ----
    oh = oh_ref[0]                                                    # (S, sumV)
    x = jnp.dot(oh, embin_w_ref[...], preferred_element_type=f32) + embin_b_ref[...]

    # ---- Conv1d(D, D, P, stride=P) as per-tap selection matmuls ----
    # sel_ref[k] is (L, S) with row 0 all-zero (reserved for the CLS token).
    seq = jnp.zeros((seq_len, d_model), f32)
    for tap in range(patch_size):
        xk = jnp.dot(sel_ref[tap], x, preferred_element_type=f32)     # (L, D)
        seq = seq + jnp.dot(xk, pw_ref[tap], preferred_element_type=f32)
    row = jax.lax.broadcasted_iota(jnp.int32, (seq_len, 1), 0)
    # row 0 gets CLS+pe, rows 1.. get conv_bias+pe (pe folded host-side).
    x2 = seq + jnp.where(row == 0, clspe_ref[...], pbpe_ref[...])

    cos = cos_ref[...]
    sin = sin_ref[...]
    rot = rot_ref[...]
    msk = msk_ref[...]

    # ---- transformer encoder stack ----
    for l in range(n_layers):
        q = jnp.dot(x2, wqkv_ref[l, 0], preferred_element_type=f32) + bqkv_ref[l, 0]
        k = jnp.dot(x2, wqkv_ref[l, 1], preferred_element_type=f32) + bqkv_ref[l, 1]
        v = jnp.dot(x2, wqkv_ref[l, 2], preferred_element_type=f32) + bqkv_ref[l, 2]

        # rotary (heads folded into lanes; rotate-half via block-diag rotation matmul)
        q = q * cos + jnp.dot(q, rot, preferred_element_type=f32) * sin
        k = k * cos + jnp.dot(k, rot, preferred_element_type=f32) * sin

        qf = elu1(q)
        kf = elu1(k)

        # per-head non-causal linear attention, heads kept folded via the
        # block-diagonal head mask on the (D, D) KV matrix.
        kv = jax.lax.dot_general(kf, v, (((0,), (0,)), ((), ())),
                                 preferred_element_type=f32)          # (D, D)
        num = jnp.dot(qf, kv * msk, preferred_element_type=f32)       # (L, D)
        ksum = jnp.sum(kf, axis=0, keepdims=True)                     # (1, D)
        den = jnp.dot(qf * ksum, msk, preferred_element_type=f32) + attn_eps
        a = num * pl.reciprocal(den, approx=True)

        a = jnp.dot(a, wo_ref[l], preferred_element_type=f32) + bo_ref[l]
        x2 = layernorm(x2 + a, n1g_ref[l], n1b_ref[l])                # residual + LN1

        y = jax.nn.gelu(jnp.dot(x2, ff1w_ref[l], preferred_element_type=f32)
                        + ff1b_ref[l])
        y = jnp.dot(y, ff2w_ref[l], preferred_element_type=f32) + ff2b_ref[l]
        x2 = layernorm(x2 + y, n2g_ref[l], n2b_ref[l])                # residual + LN2

    # ---- final LayerNorm on the CLS row only, then to_out ----
    cls_row = layernorm(x2[0:1, :], ng_ref[...], nb_ref[...])         # (1, D)
    o_ref[0] = jnp.dot(cls_row, ow_ref[...], preferred_element_type=f32) + ob_ref[...]


# ------------------------------- forward pass --------------------------------

def _const_index_map(rank):
    zeros = (0,) * rank
    return lambda n: zeros


def patch_discriminator_forward(params, tokens, cfg):
    """tokens: (N, S, 7) int32. Returns (N, 1) f32 (cond=None path)."""
    N, S, _ = tokens.shape
    D = cfg["d_model"]
    P = cfg["patch_size"]
    H = cfg["n_heads"]
    Dh = D // H
    Lyr = cfg["n_layers"]
    assert D % H == 0
    assert S % P == 0, "Input shape not divisible by patch size"
    n_patches = S // P
    L = n_patches + 1          # CLS + patches

    vocab = [cfg["n_tokens"][k] for k in cfg["keys"]]

    # --- to_one_hot: concat the 7 one-hot fields (matches MultiEmbeddingLinear input) ---
    onehot = jnp.concatenate(
        [jax.nn.one_hot(tokens[:, :, j], V, dtype=jnp.float32)
         for j, V in enumerate(vocab)], axis=-1)                      # (N, S, sumV)
    sumV = onehot.shape[-1]

    # --- one-time, param-only algebraic folds (tiny; hoisted out of the grid) ---
    # (oh @ Wemb + bemb) @ Win + bin  =  oh @ (Wemb@Win) + (bemb@Win + bin)
    embin_w = jnp.dot(params["emb_w"], params["in_w"])                # (sumV, D)
    embin_b = jnp.dot(params["emb_b"], params["in_w"]) + params["in_b"]  # (1, D)

    # --- constant structure matrices (hoisted; shared by all layers) ---
    sel = np.zeros((P, L, S), np.float32)          # per-tap patch selection (row 0 = CLS)
    for k in range(P):
        for pch in range(n_patches):
            sel[k, 1 + pch, pch * P + k] = 1.0
    sel = jnp.asarray(sel)

    rotR = np.zeros((D, D), np.float32)            # rotate-half per head:  x @ R
    half = Dh // 2
    for h in range(H):
        b0 = h * Dh
        for j in range(half):
            rotR[b0 + half + j, b0 + j] = -1.0
            rotR[b0 + j, b0 + half + j] = 1.0
    rotR = jnp.asarray(rotR)

    headM = np.zeros((D, D), np.float32)           # block-diagonal head mask
    for h in range(H):
        headM[h * Dh:(h + 1) * Dh, h * Dh:(h + 1) * Dh] = 1.0
    headM = jnp.asarray(headM)

    inv_freq = 1.0 / (10000.0 ** (np.arange(0, Dh, 2, dtype=np.float32) / Dh))
    t = np.arange(L, dtype=np.float32)
    freqs = np.outer(t, inv_freq)                                   # (L, Dh//2)
    emb = np.concatenate([freqs, freqs], axis=-1)                   # (L, Dh)
    cos = jnp.asarray(np.tile(np.cos(emb), (1, H)))                 # (L, D)
    sin = jnp.asarray(np.tile(np.sin(emb), (1, H)))                 # (L, D)

    # PositionalEncoding: single row pe[seq_len], exactly as the reference does;
    # folded into the CLS token (row 0) and the conv bias (rows 1..).
    div_term = np.exp(np.arange(0, D, 2, dtype=np.float32) * (-math.log(10000.0) / D))
    ang = float(L) * div_term
    pe = np.zeros((D,), np.float32)
    pe[0::2] = np.sin(ang)
    pe[1::2] = np.cos(ang)
    pe = jnp.asarray(pe.reshape(1, D))
    clspe = params["cls"] + pe                                       # (1, D)
    pbpe = params["patch_b"] + pe                                    # (1, D)

    kernel = functools.partial(
        _forward_kernel, n_layers=Lyr, patch_size=P, seq_len=L, d_model=D,
        ln_eps=1e-5, attn_eps=1e-6)

    const_inputs = [
        embin_w, embin_b,
        sel, params["patch_w"], clspe, pbpe,
        cos, sin, rotR, headM,
        params["wqkv"], params["bqkv"], params["wo"], params["bo"],
        params["n1g"], params["n1b"], params["ff1w"], params["ff1b"],
        params["ff2w"], params["ff2b"], params["n2g"], params["n2b"],
        params["norm_g"], params["norm_b"], params["out_w"], params["out_b"],
    ]

    in_specs = ([pl.BlockSpec((1, S, sumV), lambda n: (n, 0, 0))]
                + [pl.BlockSpec(tuple(a.shape), _const_index_map(a.ndim))
                   for a in const_inputs])

    out = pl.pallas_call(
        kernel,
        out_shape=jax.ShapeDtypeStruct((N, 1, 1), jnp.float32),
        grid=(N,),
        in_specs=in_specs,
        out_specs=pl.BlockSpec((1, 1, 1), lambda n: (n, 0, 0)),
        compiler_params=pltpu.CompilerParams(
            dimension_semantics=("parallel",)),     # v7x: one batch element per TensorCore
    )(onehot, *const_inputs)
    return out.reshape(N, 1)


# ----------------------------- parameter setup -------------------------------

def _init_linear(key, fan_in, fan_out):
    kw, kb = jax.random.split(key)
    w = jax.random.normal(kw, (fan_in, fan_out), jnp.float32) * 0.02
    b = jax.random.normal(kb, (fan_out,), jnp.float32) * 0.01
    return w, b


def make_params(cfg, key):
    keys = iter(jax.random.split(key, 256))
    D = cfg["d_model"]
    P = cfg["patch_size"]
    F = cfg["ff_dim"]
    Lyr = cfg["n_layers"]
    vocab = [cfg["n_tokens"][k] for k in cfg["keys"]]
    embsz = [cfg["emb_sizes"][k] for k in cfg["keys"]]
    sumV, sumE = sum(vocab), sum(embsz)

    p = {}

    # CPLinear per field -> block-diagonal weight; sqrt(E) baked into w AND b
    # (reference computes (x @ W + b) * sqrt(E), so the bias is scaled too).
    emb_w = np.zeros((sumV, sumE), np.float32)
    emb_b = np.zeros((sumE,), np.float32)
    r = c = 0
    for V, E in zip(vocab, embsz):
        w, b = _init_linear(next(keys), V, E)
        s = math.sqrt(E)
        emb_w[r:r + V, c:c + E] = np.asarray(w) * s
        emb_b[c:c + E] = np.asarray(b) * s
        r += V
        c += E
    p["emb_w"] = jnp.asarray(emb_w)
    p["emb_b"] = jnp.asarray(emb_b).reshape(1, sumE)

    w, b = _init_linear(next(keys), sumE, D)
    p["in_w"], p["in_b"] = w, b.reshape(1, D)

    # Conv1d weight (C_out, C_in, K) -> per-tap (K, C_in, C_out)
    wconv = jax.random.normal(next(keys), (D, D, P), jnp.float32) * 0.02
    p["patch_w"] = jnp.transpose(wconv, (2, 1, 0))                    # (P, D, D)
    p["patch_b"] = (jax.random.normal(next(keys), (D,), jnp.float32) * 0.01).reshape(1, D)

    p["cls"] = jax.random.normal(next(keys), (1, D), jnp.float32)

    wqkv, bqkv, wo, bo = [], [], [], []
    ff1w, ff1b, ff2w, ff2b = [], [], [], []
    for _ in range(Lyr):
        wq, bq = _init_linear(next(keys), D, D)
        wk, bk = _init_linear(next(keys), D, D)
        wv, bv = _init_linear(next(keys), D, D)
        wqkv.append(jnp.stack([wq, wk, wv]))                          # (3, D, D)
        bqkv.append(jnp.stack([bq, bk, bv]).reshape(3, 1, D))         # (3, 1, D)
        w, b = _init_linear(next(keys), D, D)
        wo.append(w); bo.append(b.reshape(1, D))
        w, b = _init_linear(next(keys), D, F)
        ff1w.append(w); ff1b.append(b.reshape(1, F))
        w, b = _init_linear(next(keys), F, D)
        ff2w.append(w); ff2b.append(b.reshape(1, D))
    p["wqkv"] = jnp.stack(wqkv)       # (Lyr, 3, D, D)
    p["bqkv"] = jnp.stack(bqkv)       # (Lyr, 3, 1, D)
    p["wo"] = jnp.stack(wo)           # (Lyr, D, D)
    p["bo"] = jnp.stack(bo)           # (Lyr, 1, D)
    p["ff1w"] = jnp.stack(ff1w)       # (Lyr, D, F)
    p["ff1b"] = jnp.stack(ff1b)       # (Lyr, 1, F)
    p["ff2w"] = jnp.stack(ff2w)       # (Lyr, F, D)
    p["ff2b"] = jnp.stack(ff2b)       # (Lyr, 1, D)

    ones = jnp.ones((Lyr, 1, D), jnp.float32)
    zeros = jnp.zeros((Lyr, 1, D), jnp.float32)
    p["n1g"], p["n1b"], p["n2g"], p["n2b"] = ones, zeros, ones, zeros
    p["norm_g"] = jnp.ones((1, D), jnp.float32)
    p["norm_b"] = jnp.zeros((1, D), jnp.float32)

    w, b = _init_linear(next(keys), D, 1)
    p["out_w"], p["out_b"] = w, b.reshape(1, 1)
    return p


# ---------------------------------- main --------------------------------------

if __name__ == "__main__":
    cfg = {
        "keys": ["tempo_key", "chord_key", "barbeat_key", "type_key",
                 "pitch_key", "duration_key", "velocity_key"],
        "n_tokens": {"tempo_key": 8, "chord_key": 8, "barbeat_key": 8,
                     "type_key": 4, "pitch_key": 16, "duration_key": 8,
                     "velocity_key": 8},
        "emb_sizes": {"tempo_key": 16, "chord_key": 16, "barbeat_key": 8,
                      "type_key": 8, "pitch_key": 16, "duration_key": 16,
                      "velocity_key": 16},
        "d_model": 32,
        "n_heads": 4,
        "n_layers": 2,
        "ff_dim": 64,
        "patch_size": 4,
    }

    root = jax.random.PRNGKey(0)
    pkey, dkey = jax.random.split(root)
    params = make_params(cfg, pkey)

    batch, seq = 2, 16
    cols = []
    for kname in cfg["keys"]:
        dkey, sub = jax.random.split(dkey)
        cols.append(jax.random.randint(sub, (batch, seq), 0, cfg["n_tokens"][kname]))
    tokens = jnp.stack(cols, axis=-1).astype(jnp.int32)   # (2, 16, 7)

    fwd = jax.jit(functools.partial(patch_discriminator_forward, cfg=cfg))
    out = fwd(params, tokens)
    out = jax.block_until_ready(out)
    assert out.shape == (batch, 1), out.shape
    assert bool(jnp.all(jnp.isfinite(out)))
    print("KERNEL_OK")
</pallas_src>

<mosaic_0001>
module attributes {stable_mosaic.version = 11 : i64} {
  func.func @_forward_kernel(%arg0: i32, %arg1: memref<1x16x60xf32, #tpu.memory_space<vmem>>, %arg2: memref<60x32xf32, #tpu.memory_space<vmem>>, %arg3: memref<1x32xf32, #tpu.memory_space<vmem>>, %arg4: memref<4x5x16xf32, #tpu.memory_space<vmem>>, %arg5: memref<4x32x32xf32, #tpu.memory_space<vmem>>, %arg6: memref<1x32xf32, #tpu.memory_space<vmem>>, %arg7: memref<1x32xf32, #tpu.memory_space<vmem>>, %arg8: memref<5x32xf32, #tpu.memory_space<vmem>>, %arg9: memref<5x32xf32, #tpu.memory_space<vmem>>, %arg10: memref<32x32xf32, #tpu.memory_space<vmem>>, %arg11: memref<32x32xf32, #tpu.memory_space<vmem>>, %arg12: memref<2x3x32x32xf32, #tpu.memory_space<vmem>>, %arg13: memref<2x3x1x32xf32, #tpu.memory_space<vmem>>, %arg14: memref<2x32x32xf32, #tpu.memory_space<vmem>>, %arg15: memref<2x1x32xf32, #tpu.memory_space<vmem>>, %arg16: memref<2x1x32xf32, #tpu.memory_space<vmem>>, %arg17: memref<2x1x32xf32, #tpu.memory_space<vmem>>, %arg18: memref<2x32x64xf32, #tpu.memory_space<vmem>>, %arg19: memref<2x1x64xf32, #tpu.memory_space<vmem>>, %arg20: memref<2x64x32xf32, #tpu.memory_space<vmem>>, %arg21: memref<2x1x32xf32, #tpu.memory_space<vmem>>, %arg22: memref<2x1x32xf32, #tpu.memory_space<vmem>>, %arg23: memref<2x1x32xf32, #tpu.memory_space<vmem>>, %arg24: memref<1x32xf32, #tpu.memory_space<vmem>>, %arg25: memref<1x32xf32, #tpu.memory_space<vmem>>, %arg26: memref<32x1xf32, #tpu.memory_space<vmem>>, %arg27: memref<1x1xf32, #tpu.memory_space<vmem>>, %arg28: memref<1x1x1xf32, #tpu.memory_space<vmem>>) attributes {dimension_semantics = [#tpu.dimension_semantics<parallel>], iteration_bounds = array<i64: 2>, scalar_prefetch = 0 : i64, scratch_operands = 0 : i64, tpu.core_type = #tpu.core_type<tc>, window_params = [{transform_indices = @transform_0, window_bounds = array<i64: 1, 16, 60>}, {pipeline_mode = #tpu.pipeline_mode<synchronous>, transform_indices = @transform_1, window_bounds = array<i64: 60, 32>}, {pipeline_mode = #tpu.pipeline_mode<synchronous>, transform_indices = @transform_2, window_bounds = array<i64: 1, 32>}, {pipeline_mode = #tpu.pipeline_mode<synchronous>, transform_indices = @transform_3, window_bounds = array<i64: 4, 5, 16>}, {pipeline_mode = #tpu.pipeline_mode<synchronous>, transform_indices = @transform_4, window_bounds = array<i64: 4, 32, 32>}, {pipeline_mode = #tpu.pipeline_mode<synchronous>, transform_indices = @transform_5, window_bounds = array<i64: 1, 32>}, {pipeline_mode = #tpu.pipeline_mode<synchronous>, transform_indices = @transform_6, window_bounds = array<i64: 1, 32>}, {pipeline_mode = #tpu.pipeline_mode<synchronous>, transform_indices = @transform_7, window_bounds = array<i64: 5, 32>}, {pipeline_mode = #tpu.pipeline_mode<synchronous>, transform_indices = @transform_8, window_bounds = array<i64: 5, 32>}, {pipeline_mode = #tpu.pipeline_mode<synchronous>, transform_indices = @transform_9, window_bounds = array<i64: 32, 32>}, {pipeline_mode = #tpu.pipeline_mode<synchronous>, transform_indices = @transform_10, window_bounds = array<i64: 32, 32>}, {pipeline_mode = #tpu.pipeline_mode<synchronous>, transform_indices = @transform_11, window_bounds = array<i64: 2, 3, 32, 32>}, {pipeline_mode = #tpu.pipeline_mode<synchronous>, transform_indices = @transform_12, window_bounds = array<i64: 2, 3, 1, 32>}, {pipeline_mode = #tpu.pipeline_mode<synchronous>, transform_indices = @transform_13, window_bounds = array<i64: 2, 32, 32>}, {pipeline_mode = #tpu.pipeline_mode<synchronous>, transform_indices = @transform_14, window_bounds = array<i64: 2, 1, 32>}, {pipeline_mode = #tpu.pipeline_mode<synchronous>, transform_indices = @transform_15, window_bounds = array<i64: 2, 1, 32>}, {pipeline_mode = #tpu.pipeline_mode<synchronous>, transform_indices = @transform_16, window_bounds = array<i64: 2, 1, 32>}, {pipeline_mode = #tpu.pipeline_mode<synchronous>, transform_indices = @transform_17, window_bounds = array<i64: 2, 32, 64>}, {pipeline_mode = #tpu.pipeline_mode<synchronous>, transform_indices = @transform_18, window_bounds = array<i64: 2, 1, 64>}, {pipeline_mode = #tpu.pipeline_mode<synchronous>, transform_indices = @transform_19, window_bounds = array<i64: 2, 64, 32>}, {pipeline_mode = #tpu.pipeline_mode<synchronous>, transform_indices = @transform_20, window_bounds = array<i64: 2, 1, 32>}, {pipeline_mode = #tpu.pipeline_mode<synchronous>, transform_indices = @transform_21, window_bounds = array<i64: 2, 1, 32>}, {pipeline_mode = #tpu.pipeline_mode<synchronous>, transform_indices = @transform_22, window_bounds = array<i64: 2, 1, 32>}, {pipeline_mode = #tpu.pipeline_mode<synchronous>, transform_indices = @transform_23, window_bounds = array<i64: 1, 32>}, {pipeline_mode = #tpu.pipeline_mode<synchronous>, transform_indices = @transform_24, window_bounds = array<i64: 1, 32>}, {pipeline_mode = #tpu.pipeline_mode<synchronous>, transform_indices = @transform_25, window_bounds = array<i64: 32, 1>}, {pipeline_mode = #tpu.pipeline_mode<synchronous>, transform_indices = @transform_26, window_bounds = array<i64: 1, 1>}, {transform_indices = @transform_27, window_bounds = array<i64: 1, 1, 1>}]} {
    %c0 = arith.constant 0 : index
    %c0_0 = arith.constant 0 : index
    %c0_1 = arith.constant 0 : index
    %0 = vector.load %arg1[%c0, %c0_0, %c0_1] : memref<1x16x60xf32, #tpu.memory_space<vmem>>, vector<1x16x60xf32>
    %1 = vector.shape_cast %0 : vector<1x16x60xf32> to vector<16x60xf32>
    %c0_2 = arith.constant 0 : index
    %c0_3 = arith.constant 0 : index
    %2 = vector.load %arg2[%c0_2, %c0_3] : memref<60x32xf32, #tpu.memory_space<vmem>>, vector<60x32xf32>
    %cst = arith.constant dense<0.000000e+00> : vector<16x32xf32>
    %3 = tpu.matmul %1, %2, %cst {dimension_numbers = #tpu.dot_dimension_numbers<[1], [0], [0], [1], [0, 0, 1, 1], [], []>} : vector<16x60xf32>, vector<60x32xf32>, vector<16x32xf32> -> vector<16x32xf32>
    %c0_4 = arith.constant 0 : index
    %c0_5 = arith.constant 0 : index
    %4 = vector.load %arg3[%c0_4, %c0_5] : memref<1x32xf32, #tpu.memory_space<vmem>>, vector<1x32xf32>
    %5 = vector.broadcast %4 : vector<1x32xf32> to vector<16x32xf32>
    %6 = arith.addf %3, %5 : vector<16x32xf32>
    %cst_6 = arith.constant 0.000000e+00 : f32
    %7 = vector.broadcast %cst_6 : f32 to vector<5x32xf32>
    %c0_7 = arith.constant 0 : index
    %c0_8 = arith.constant 0 : index
    %c0_9 = arith.constant 0 : index
    %8 = vector.load %arg4[%c0_7, %c0_8, %c0_9] : memref<4x5x16xf32, #tpu.memory_space<vmem>>, vector<1x5x16xf32>
    %9 = vector.shape_cast %8 : vector<1x5x16xf32> to vector<5x16xf32>
    %cst_10 = arith.constant dense<0.000000e+00> : vector<5x32xf32>
    %10 = tpu.matmul %9, %6, %cst_10 {dimension_numbers = #tpu.dot_dimension_numbers<[1], [0], [0], [1], [0, 0, 1, 1], [], []>} : vector<5x16xf32>, vector<16x32xf32>, vector<5x32xf32> -> vector<5x32xf32>
    %c0_11 = arith.constant 0 : index
    %c0_12 = arith.constant 0 : index
    %c0_13 = arith.constant 0 : index
    %11 = vector.load %arg5[%c0_11, %c0_12, %c0_13] : memref<4x32x32xf32, #tpu.memory_space<vmem>>, vector<1x32x32xf32>
    %12 = vector.shape_cast %11 : vector<1x32x32xf32> to vector<32x32xf32>
    %cst_14 = arith.constant dense<0.000000e+00> : vector<5x32xf32>
    %13 = tpu.matmul %10, %12, %cst_14 {dimension_numbers = #tpu.dot_dimension_numbers<[1], [0], [0], [1], [0, 0, 1, 1], [], []>} : vector<5x32xf32>, vector<32x32xf32>, vector<5x32xf32> -> vector<5x32xf32>
    %14 = arith.addf %7, %13 : vector<5x32xf32>
    %c1 = arith.constant 1 : index
    %c0_15 = arith.constant 0 : index
    %c0_16 = arith.constant 0 : index
    %15 = vector.load %arg4[%c1, %c0_15, %c0_16] : memref<4x5x16xf32, #tpu.memory_space<vmem>>, vector<1x5x16xf32>
    %16 = vector.shape_cast %15 : vector<1x5x16xf32> to vector<5x16xf32>
    %cst_17 = arith.constant dense<0.000000e+00> : vector<5x32xf32>
    %17 = tpu.matmul %16, %6, %cst_17 {dimension_numbers = #tpu.dot_dimension_numbers<[1], [0], [0], [1], [0, 0, 1, 1], [], []>} : vector<5x16xf32>, vector<16x32xf32>, vector<5x32xf32> -> vector<5x32xf32>
    %c1_18 = arith.constant 1 : index
    %c0_19 = arith.constant 0 : index
    %c0_20 = arith.constant 0 : index
    %18 = vector.load %arg5[%c1_18, %c0_19, %c0_20] : memref<4x32x32xf32, #tpu.memory_space<vmem>>, vector<1x32x32xf32>
    %19 = vector.shape_cast %18 : vector<1x32x32xf32> to vector<32x32xf32>
    %cst_21 = arith.constant dense<0.000000e+00> : vector<5x32xf32>
    %20 = tpu.matmul %17, %19, %cst_21 {dimension_numbers = #tpu.dot_dimension_numbers<[1], [0], [0], [1], [0, 0, 1, 1], [], []>} : vector<5x32xf32>, vector<32x32xf32>, vector<5x32xf32> -> vector<5x32xf32>
    %21 = arith.addf %14, %20 : vector<5x32xf32>
    %c2 = arith.constant 2 : index
    %c0_22 = arith.constant 0 : index
    %c0_23 = arith.constant 0 : index
    %22 = vector.load %arg4[%c2, %c0_22, %c0_23] : memref<4x5x16xf32, #tpu.memory_space<vmem>>, vector<1x5x16xf32>
    %23 = vector.shape_cast %22 : vector<1x5x16xf32> to vector<5x16xf32>
    %cst_24 = arith.constant dense<0.000000e+00> : vector<5x32xf32>
    %24 = tpu.matmul %23, %6, %cst_24 {dimension_numbers = #tpu.dot_dimension_numbers<[1], [0], [0], [1], [0, 0, 1, 1], [], []>} : vector<5x16xf32>, vector<16x32xf32>, vector<5x32xf32> -> vector<5x32xf32>
    %c2_25 = arith.constant 2 : index
    %c0_26 = arith.constant 0 : index
    %c0_27 = arith.constant 0 : index
    %25 = vector.load %arg5[%c2_25, %c0_26, %c0_27] : memref<4x32x32xf32, #tpu.memory_space<vmem>>, vector<1x32x32xf32>
    %26 = vector.shape_cast %25 : vector<1x32x32xf32> to vector<32x32xf32>
    %cst_28 = arith.constant dense<0.000000e+00> : vector<5x32xf32>
    %27 = tpu.matmul %24, %26, %cst_28 {dimension_numbers = #tpu.dot_dimension_numbers<[1], [0], [0], [1], [0, 0, 1, 1], [], []>} : vector<5x32xf32>, vector<32x32xf32>, vector<5x32xf32> -> vector<5x32xf32>
    %28 = arith.addf %21, %27 : vector<5x32xf32>
    %c3 = arith.constant 3 : index
    %c0_29 = arith.constant 0 : index
    %c0_30 = arith.constant 0 : index
    %29 = vector.load %arg4[%c3, %c0_29, %c0_30] : memref<4x5x16xf32, #tpu.memory_space<vmem>>, vector<1x5x16xf32>
    %30 = vector.shape_cast %29 : vector<1x5x16xf32> to vector<5x16xf32>
    %cst_31 = arith.constant dense<0.000000e+00> : vector<5x32xf32>
    %31 = tpu.matmul %30, %6, %cst_31 {dimension_numbers = #tpu.dot_dimension_numbers<[1], [0], [0], [1], [0, 0, 1, 1], [], []>} : vector<5x16xf32>, vector<16x32xf32>, vector<5x32xf32> -> vector<5x32xf32>
    %c3_32 = arith.constant 3 : index
    %c0_33 = arith.constant 0 : index
    %c0_34 = arith.constant 0 : index
    %32 = vector.load %arg5[%c3_32, %c0_33, %c0_34] : memref<4x32x32xf32, #tpu.memory_space<vmem>>, vector<1x32x32xf32>
    %33 = vector.shape_cast %32 : vector<1x32x32xf32> to vector<32x32xf32>
    %cst_35 = arith.constant dense<0.000000e+00> : vector<5x32xf32>
    %34 = tpu.matmul %31, %33, %cst_35 {dimension_numbers = #tpu.dot_dimension_numbers<[1], [0], [0], [1], [0, 0, 1, 1], [], []>} : vector<5x32xf32>, vector<32x32xf32>, vector<5x32xf32> -> vector<5x32xf32>
    %35 = arith.addf %28, %34 : vector<5x32xf32>
    %36 = tpu.iota {dimensions = array<i32: 0>} : vector<5x1xi32>
    %c0_i32 = arith.constant 0 : i32
    %37 = vector.broadcast %c0_i32 : i32 to vector<5x1xi32>
    %38 = arith.cmpi eq, %36, %37 : vector<5x1xi32>
    %c0_36 = arith.constant 0 : index
    %c0_37 = arith.constant 0 : index
    %39 = vector.load %arg6[%c0_36, %c0_37] : memref<1x32xf32, #tpu.memory_space<vmem>>, vector<1x32xf32>
    %c0_38 = arith.constant 0 : index
    %c0_39 = arith.constant 0 : index
    %40 = vector.load %arg7[%c0_38, %c0_39] : memref<1x32xf32, #tpu.memory_space<vmem>>, vector<1x32xf32>
    %41 = vector.shape_cast %38 : vector<5x1xi1> to vector<5x1xi1>
    %42 = vector.broadcast %41 : vector<5x1xi1> to vector<5x32xi1>
    %43 = vector.shape_cast %39 : vector<1x32xf32> to vector<1x32xf32>
    %44 = vector.broadcast %43 : vector<1x32xf32> to vector<5x32xf32>
    %45 = vector.shape_cast %40 : vector<1x32xf32> to vector<1x32xf32>
    %46 = vector.broadcast %45 : vector<1x32xf32> to vector<5x32xf32>
    %47 = arith.select %42, %44, %46 : vector<5x32xi1>, vector<5x32xf32>
    %48 = arith.addf %35, %47 : vector<5x32xf32>
    %c0_40 = arith.constant 0 : index
    %c0_41 = arith.constant 0 : index
    %49 = vector.load %arg8[%c0_40, %c0_41] : memref<5x32xf32, #tpu.memory_space<vmem>>, vector<5x32xf32>
    %c0_42 = arith.constant 0 : index
    %c0_43 = arith.constant 0 : index
    %50 = vector.load %arg9[%c0_42, %c0_43] : memref<5x32xf32, #tpu.memory_space<vmem>>, vector<5x32xf32>
    %c0_44 = arith.constant 0 : index
    %c0_45 = arith.constant 0 : index
    %51 = vector.load %arg10[%c0_44, %c0_45] : memref<32x32xf32, #tpu.memory_space<vmem>>, vector<32x32xf32>
    %c0_46 = arith.constant 0 : index
    %c0_47 = arith.constant 0 : index
    %52 = vector.load %arg11[%c0_46, %c0_47] : memref<32x32xf32, #tpu.memory_space<vmem>>, vector<32x32xf32>
    %c0_48 = arith.constant 0 : index
    %c0_49 = arith.constant 0 : index
    %c0_50 = arith.constant 0 : index
    %c0_51 = arith.constant 0 : index
    %53 = vector.load %arg12[%c0_48, %c0_49, %c0_50, %c0_51] : memref<2x3x32x32xf32, #tpu.memory_space<vmem>>, vector<1x1x32x32xf32>
    %54 = vector.shape_cast %53 : vector<1x1x32x32xf32> to vector<32x32xf32>
    %cst_52 = arith.constant dense<0.000000e+00> : vector<5x32xf32>
    %55 = tpu.matmul %48, %54, %cst_52 {dimension_numbers = #tpu.dot_dimension_numbers<[1], [0], [0], [1], [0, 0, 1, 1], [], []>} : vector<5x32xf32>, vector<32x32xf32>, vector<5x32xf32> -> vector<5x32xf32>
    %c0_53 = arith.constant 0 : index
    %c0_54 = arith.constant 0 : index
    %c0_55 = arith.constant 0 : index
    %c0_56 = arith.constant 0 : index
    %56 = vector.load %arg13[%c0_53, %c0_54, %c0_55, %c0_56] : memref<2x3x1x32xf32, #tpu.memory_space<vmem>>, vector<1x1x1x32xf32>
    %57 = vector.shape_cast %56 : vector<1x1x1x32xf32> to vector<1x32xf32>
    %58 = vector.broadcast %57 : vector<1x32xf32> to vector<5x32xf32>
    %59 = arith.addf %55, %58 : vector<5x32xf32>
    %c0_57 = arith.constant 0 : index
    %c1_58 = arith.constant 1 : index
    %c0_59 = arith.constant 0 : index
    %c0_60 = arith.constant 0 : index
    %60 = vector.load %arg12[%c0_57, %c1_58, %c0_59, %c0_60] : memref<2x3x32x32xf32, #tpu.memory_space<vmem>>, vector<1x1x32x32xf32>
    %61 = vector.shape_cast %60 : vector<1x1x32x32xf32> to vector<32x32xf32>
    %cst_61 = arith.constant dense<0.000000e+00> : vector<5x32xf32>
    %62 = tpu.matmul %48, %61, %cst_61 {dimension_numbers = #tpu.dot_dimension_numbers<[1], [0], [0], [1], [0, 0, 1, 1], [], []>} : vector<5x32xf32>, vector<32x32xf32>, vector<5x32xf32> -> vector<5x32xf32>
    %c0_62 = arith.constant 0 : index
    %c1_63 = arith.constant 1 : index
    %c0_64 = arith.constant 0 : index
    %c0_65 = arith.constant 0 : index
    %63 = vector.load %arg13[%c0_62, %c1_63, %c0_64, %c0_65] : memref<2x3x1x32xf32, #tpu.memory_space<vmem>>, vector<1x1x1x32xf32>
    %64 = vector.shape_cast %63 : vector<1x1x1x32xf32> to vector<1x32xf32>
    %65 = vector.broadcast %64 : vector<1x32xf32> to vector<5x32xf32>
    %66 = arith.addf %62, %65 : vector<5x32xf32>
    %c0_66 = arith.constant 0 : index
    %c2_67 = arith.constant 2 : index
    %c0_68 = arith.constant 0 : index
    %c0_69 = arith.constant 0 : index
    %67 = vector.load %arg12[%c0_66, %c2_67, %c0_68, %c0_69] : memref<2x3x32x32xf32, #tpu.memory_space<vmem>>, vector<1x1x32x32xf32>
    %68 = vector.shape_cast %67 : vector<1x1x32x32xf32> to vector<32x32xf32>
    %cst_70 = arith.constant dense<0.000000e+00> : vector<5x32xf32>
    %69 = tpu.matmul %48, %68, %cst_70 {dimension_numbers = #tpu.dot_dimension_numbers<[1], [0], [0], [1], [0, 0, 1, 1], [], []>} : vector<5x32xf32>, vector<32x32xf32>, vector<5x32xf32> -> vector<5x32xf32>
    %c0_71 = arith.constant 0 : index
    %c2_72 = arith.constant 2 : index
    %c0_73 = arith.constant 0 : index
    %c0_74 = arith.constant 0 : index
    %70 = vector.load %arg13[%c0_71, %c2_72, %c0_73, %c0_74] : memref<2x3x1x32xf32, #tpu.memory_space<vmem>>, vector<1x1x1x32xf32>
    %71 = vector.shape_cast %70 : vector<1x1x1x32xf32> to vector<1x32xf32>
    %72 = vector.broadcast %71 : vector<1x32xf32> to vector<5x32xf32>
    %73 = arith.addf %69, %72 : vector<5x32xf32>
    %74 = arith.mulf %59, %49 : vector<5x32xf32>
    %cst_75 = arith.constant dense<0.000000e+00> : vector<5x32xf32>
    %75 = tpu.matmul %59, %51, %cst_75 {dimension_numbers = #tpu.dot_dimension_numbers<[1], [0], [0], [1], [0, 0, 1, 1], [], []>} : vector<5x32xf32>, vector<32x32xf32>, vector<5x32xf32> -> vector<5x32xf32>
    %76 = arith.mulf %75, %50 : vector<5x32xf32>
    %77 = arith.addf %74, %76 : vector<5x32xf32>
    %78 = arith.mulf %66, %49 : vector<5x32xf32>
    %cst_76 = arith.constant dense<0.000000e+00> : vector<5x32xf32>
    %79 = tpu.matmul %66, %51, %cst_76 {dimension_numbers = #tpu.dot_dimension_numbers<[1], [0], [0], [1], [0, 0, 1, 1], [], []>} : vector<5x32xf32>, vector<32x32xf32>, vector<5x32xf32> -> vector<5x32xf32>
    %80 = arith.mulf %79, %50 : vector<5x32xf32>
    %81 = arith.addf %78, %80 : vector<5x32xf32>
    %cst_77 = arith.constant 0.000000e+00 : f32
    %82 = vector.broadcast %cst_77 : f32 to vector<5x32xf32>
    %83 = arith.cmpf ogt, %77, %82 : vector<5x32xf32>
    %cst_78 = arith.constant 0.000000e+00 : f32
    %84 = vector.broadcast %cst_78 : f32 to vector<5x32xf32>
    %85 = arith.minimumf %77, %84 : vector<5x32xf32>
    %86 = math.exp %85 : vector<5x32xf32>
    %cst_79 = arith.constant 1.000000e+00 : f32
    %87 = vector.broadcast %cst_79 : f32 to vector<5x32xf32>
    %88 = arith.subf %86, %87 : vector<5x32xf32>
    %89 = arith.select %83, %77, %88 : vector<5x32xi1>, vector<5x32xf32>
    %cst_80 = arith.constant 1.000000e+00 : f32
    %90 = vector.broadcast %cst_80 : f32 to vector<5x32xf32>
    %91 = arith.addf %89, %90 : vector<5x32xf32>
    %cst_81 = arith.constant 0.000000e+00 : f32
    %92 = vector.broadcast %cst_81 : f32 to vector<5x32xf32>
    %93 = arith.cmpf ogt, %81, %92 : vector<5x32xf32>
    %cst_82 = arith.constant 0.000000e+00 : f32
    %94 = vector.broadcast %cst_82 : f32 to vector<5x32xf32>
    %95 = arith.minimumf %81, %94 : vector<5x32xf32>
    %96 = math.exp %95 : vector<5x32xf32>
    %cst_83 = arith.constant 1.000000e+00 : f32
    %97 = vector.broadcast %cst_83 : f32 to vector<5x32xf32>
    %98 = arith.subf %96, %97 : vector<5x32xf32>
    %99 = arith.select %93, %81, %98 : vector<5x32xi1>, vector<5x32xf32>
    %cst_84 = arith.constant 1.000000e+00 : f32
    %100 = vector.broadcast %cst_84 : f32 to vector<5x32xf32>
    %101 = arith.addf %99, %100 : vector<5x32xf32>
    %cst_85 = arith.constant dense<0.000000e+00> : vector<32x32xf32>
    %102 = tpu.matmul %101, %73, %cst_85 {dimension_numbers = #tpu.dot_dimension_numbers<[0], [0], [1], [1], [0, 1, 1, 1], [], []>} : vector<5x32xf32>, vector<5x32xf32>, vector<32x32xf32> -> vector<32x32xf32>
    %103 = arith.mulf %102, %52 : vector<32x32xf32>
    %cst_86 = arith.constant dense<0.000000e+00> : vector<5x32xf32>
    %104 = tpu.matmul %91, %103, %cst_86 {dimension_numbers = #tpu.dot_dimension_numbers<[1], [0], [0], [1], [0, 0, 1, 1], [], []>} : vector<5x32xf32>, vector<32x32xf32>, vector<5x32xf32> -> vector<5x32xf32>
    %cst_87 = arith.constant dense<0.000000e+00> : vector<32xf32>
    %105 = vector.multi_reduction <add>, %101, %cst_87 [0] : vector<5x32xf32> to vector<32xf32>
    %106 = vector.shape_cast %105 : vector<32xf32> to vector<1x32xf32>
    %107 = vector.broadcast %106 : vector<1x32xf32> to vector<5x32xf32>
    %108 = arith.mulf %91, %107 : vector<5x32xf32>
    %cst_88 = arith.constant dense<0.000000e+00> : vector<5x32xf32>
    %109 = tpu.matmul %108, %52, %cst_88 {dimension_numbers = #tpu.dot_dimension_numbers<[1], [0], [0], [1], [0, 0, 1, 1], [], []>} : vector<5x32xf32>, vector<32x32xf32>, vector<5x32xf32> -> vector<5x32xf32>
    %cst_89 = arith.constant 9.99999997E-7 : f32
    %110 = vector.broadcast %cst_89 : f32 to vector<5x32xf32>
    %111 = arith.addf %109, %110 : vector<5x32xf32>
    %112 = tpu.reciprocal %111 {approx = true} : vector<5x32xf32> -> vector<5x32xf32>
    %113 = arith.mulf %104, %112 : vector<5x32xf32>
    %c0_90 = arith.constant 0 : index
    %c0_91 = arith.constant 0 : index
    %c0_92 = arith.constant 0 : index
    %114 = vector.load %arg14[%c0_90, %c0_91, %c0_92] : memref<2x32x32xf32, #tpu.memory_space<vmem>>, vector<1x32x32xf32>
    %115 = vector.shape_cast %114 : vector<1x32x32xf32> to vector<32x32xf32>
    %cst_93 = arith.constant dense<0.000000e+00> : vector<5x32xf32>
    %116 = tpu.matmul %113, %115, %cst_93 {dimension_numbers = #tpu.dot_dimension_numbers<[1], [0], [0], [1], [0, 0, 1, 1], [], []>} : vector<5x32xf32>, vector<32x32xf32>, vector<5x32xf32> -> vector<5x32xf32>
    %c0_94 = arith.constant 0 : index
    %c0_95 = arith.constant 0 : index
    %c0_96 = arith.constant 0 : index
    %117 = vector.load %arg15[%c0_94, %c0_95, %c0_96] : memref<2x1x32xf32, #tpu.memory_space<vmem>>, vector<1x1x32xf32>
    %118 = vector.shape_cast %117 : vector<1x1x32xf32> to vector<1x32xf32>
    %119 = vector.broadcast %118 : vector<1x32xf32> to vector<5x32xf32>
    %120 = arith.addf %116, %119 : vector<5x32xf32>
    %121 = arith.addf %48, %120 : vector<5x32xf32>
    %c0_97 = arith.constant 0 : index
    %c0_98 = arith.constant 0 : index
    %c0_99 = arith.constant 0 : index
    %122 = vector.load %arg16[%c0_97, %c0_98, %c0_99] : memref<2x1x32xf32, #tpu.memory_space<vmem>>, vector<1x1x32xf32>
    %123 = vector.shape_cast %122 : vector<1x1x32xf32> to vector<1x32xf32>
    %c0_100 = arith.constant 0 : index
    %c0_101 = arith.constant 0 : index
    %c0_102 = arith.constant 0 : index
    %124 = vector.load %arg17[%c0_100, %c0_101, %c0_102] : memref<2x1x32xf32, #tpu.memory_space<vmem>>, vector<1x1x32xf32>
    %125 = vector.shape_cast %124 : vector<1x1x32xf32> to vector<1x32xf32>
    %cst_103 = arith.constant dense<0.000000e+00> : vector<5xf32>
    %126 = vector.multi_reduction <add>, %121, %cst_103 [1] : vector<5x32xf32> to vector<5xf32>
    %127 = vector.shape_cast %126 : vector<5xf32> to vector<5x1xf32>
    %cst_104 = arith.constant 3.200000e+01 : f32
    %128 = vector.broadcast %cst_104 : f32 to vector<5x1xf32>
    %129 = arith.divf %127, %128 : vector<5x1xf32>
    %130 = vector.broadcast %129 : vector<5x1xf32> to vector<5x32xf32>
    %131 = arith.subf %121, %130 : vector<5x32xf32>
    %132 = arith.mulf %131, %131 : vector<5x32xf32>
    %cst_105 = arith.constant dense<0.000000e+00> : vector<5xf32>
    %133 = vector.multi_reduction <add>, %132, %cst_105 [1] : vector<5x32xf32> to vector<5xf32>
    %134 = vector.shape_cast %133 : vector<5xf32> to vector<5x1xf32>
    %cst_106 = arith.constant 3.200000e+01 : f32
    %135 = vector.broadcast %cst_106 : f32 to vector<5x1xf32>
    %136 = arith.divf %134, %135 : vector<5x1xf32>
    %cst_107 = arith.constant 9.99999974E-6 : f32
    %137 = vector.broadcast %cst_107 : f32 to vector<5x1xf32>
    %138 = arith.addf %136, %137 : vector<5x1xf32>
    %139 = math.rsqrt %138 : vector<5x1xf32>
    %140 = vector.broadcast %139 : vector<5x1xf32> to vector<5x32xf32>
    %141 = arith.mulf %131, %140 : vector<5x32xf32>
    %142 = vector.broadcast %123 : vector<1x32xf32> to vector<5x32xf32>
    %143 = arith.mulf %141, %142 : vector<5x32xf32>
    %144 = vector.broadcast %125 : vector<1x32xf32> to vector<5x32xf32>
    %145 = arith.addf %143, %144 : vector<5x32xf32>
    %c0_108 = arith.constant 0 : index
    %c0_109 = arith.constant 0 : index
    %c0_110 = arith.constant 0 : index
    %146 = vector.load %arg18[%c0_108, %c0_109, %c0_110] : memref<2x32x64xf32, #tpu.memory_space<vmem>>, vector<1x32x64xf32>
    %147 = vector.shape_cast %146 : vector<1x32x64xf32> to vector<32x64xf32>
    %cst_111 = arith.constant dense<0.000000e+00> : vector<5x64xf32>
    %148 = tpu.matmul %145, %147, %cst_111 {dimension_numbers = #tpu.dot_dimension_numbers<[1], [0], [0], [1], [0, 0, 1, 1], [], []>} : vector<5x32xf32>, vector<32x64xf32>, vector<5x64xf32> -> vector<5x64xf32>
    %c0_112 = arith.constant 0 : index
    %c0_113 = arith.constant 0 : index
    %c0_114 = arith.constant 0 : index
    %149 = vector.load %arg19[%c0_112, %c0_113, %c0_114] : memref<2x1x64xf32, #tpu.memory_space<vmem>>, vector<1x1x64xf32>
    %150 = vector.shape_cast %149 : vector<1x1x64xf32> to vector<1x64xf32>
    %151 = vector.broadcast %150 : vector<1x64xf32> to vector<5x64xf32>
    %152 = arith.addf %148, %151 : vector<5x64xf32>
    %153 = arith.mulf %152, %152 : vector<5x64xf32>
    %154 = arith.mulf %152, %153 : vector<5x64xf32>
    %cst_115 = arith.constant 4.471500e-02 : f32
    %155 = vector.broadcast %cst_115 : f32 to vector<5x64xf32>
    %156 = arith.mulf %155, %154 : vector<5x64xf32>
    %157 = arith.addf %152, %156 : vector<5x64xf32>
    %cst_116 = arith.constant 0.797884583 : f32
    %158 = vector.broadcast %cst_116 : f32 to vector<5x64xf32>
    %159 = arith.mulf %158, %157 : vector<5x64xf32>
    %160 = math.tanh %159 : vector<5x64xf32>
    %cst_117 = arith.constant 1.000000e+00 : f32
    %161 = vector.broadcast %cst_117 : f32 to vector<5x64xf32>
    %162 = arith.addf %161, %160 : vector<5x64xf32>
    %cst_118 = arith.constant 5.000000e-01 : f32
    %163 = vector.broadcast %cst_118 : f32 to vector<5x64xf32>
    %164 = arith.mulf %163, %162 : vector<5x64xf32>
    %165 = arith.mulf %152, %164 : vector<5x64xf32>
    %c0_119 = arith.constant 0 : index
    %c0_120 = arith.constant 0 : index
    %c0_121 = arith.constant 0 : index
    %166 = vector.load %arg20[%c0_119, %c0_120, %c0_121] : memref<2x64x32xf32, #tpu.memory_space<vmem>>, vector<1x64x32xf32>
    %167 = vector.shape_cast %166 : vector<1x64x32xf32> to vector<64x32xf32>
    %cst_122 = arith.constant dense<0.000000e+00> : vector<5x32xf32>
    %168 = tpu.matmul %165, %167, %cst_122 {dimension_numbers = #tpu.dot_dimension_numbers<[1], [0], [0], [1], [0, 0, 1, 1], [], []>} : vector<5x64xf32>, vector<64x32xf32>, vector<5x32xf32> -> vector<5x32xf32>
    %c0_123 = arith.constant 0 : index
    %c0_124 = arith.constant 0 : index
    %c0_125 = arith.constant 0 : index
    %169 = vector.load %arg21[%c0_123, %c0_124, %c0_125] : memref<2x1x32xf32, #tpu.memory_space<vmem>>, vector<1x1x32xf32>
    %170 = vector.shape_cast %169 : vector<1x1x32xf32> to vector<1x32xf32>
    %171 = vector.broadcast %170 : vector<1x32xf32> to vector<5x32xf32>
    %172 = arith.addf %168, %171 : vector<5x32xf32>
    %173 = arith.addf %145, %172 : vector<5x32xf32>
    %c0_126 = arith.constant 0 : index
    %c0_127 = arith.constant 0 : index
    %c0_128 = arith.constant 0 : index
    %174 = vector.load %arg22[%c0_126, %c0_127, %c0_128] : memref<2x1x32xf32, #tpu.memory_space<vmem>>, vector<1x1x32xf32>
    %175 = vector.shape_cast %174 : vector<1x1x32xf32> to vector<1x32xf32>
    %c0_129 = arith.constant 0 : index
    %c0_130 = arith.constant 0 : index
    %c0_131 = arith.constant 0 : index
    %176 = vector.load %arg23[%c0_129, %c0_130, %c0_131] : memref<2x1x32xf32, #tpu.memory_space<vmem>>, vector<1x1x32xf32>
    %177 = vector.shape_cast %176 : vector<1x1x32xf32> to vector<1x32xf32>
    %cst_132 = arith.constant dense<0.000000e+00> : vector<5xf32>
    %178 = vector.multi_reduction <add>, %173, %cst_132 [1] : vector<5x32xf32> to vector<5xf32>
    %179 = vector.shape_cast %178 : vector<5xf32> to vector<5x1xf32>
    %cst_133 = arith.constant 3.200000e+01 : f32
    %180 = vector.broadcast %cst_133 : f32 to vector<5x1xf32>
    %181 = arith.divf %179, %180 : vector<5x1xf32>
    %182 = vector.broadcast %181 : vector<5x1xf32> to vector<5x32xf32>
    %183 = arith.subf %173, %182 : vector<5x32xf32>
    %184 = arith.mulf %183, %183 : vector<5x32xf32>
    %cst_134 = arith.constant dense<0.000000e+00> : vector<5xf32>
    %185 = vector.multi_reduction <add>, %184, %cst_134 [1] : vector<5x32xf32> to vector<5xf32>
    %186 = vector.shape_cast %185 : vector<5xf32> to vector<5x1xf32>
    %cst_135 = arith.constant 3.200000e+01 : f32
    %187 = vector.broadcast %cst_135 : f32 to vector<5x1xf32>
    %188 = arith.divf %186, %187 : vector<5x1xf32>
    %cst_136 = arith.constant 9.99999974E-6 : f32
    %189 = vector.broadcast %cst_136 : f32 to vector<5x1xf32>
    %190 = arith.addf %188, %189 : vector<5x1xf32>
    %191 = math.rsqrt %190 : vector<5x1xf32>
    %192 = vector.broadcast %191 : vector<5x1xf32> to vector<5x32xf32>
    %193 = arith.mulf %183, %192 : vector<5x32xf32>
    %194 = vector.broadcast %175 : vector<1x32xf32> to vector<5x32xf32>
    %195 = arith.mulf %193, %194 : vector<5x32xf32>
    %196 = vector.broadcast %177 : vector<1x32xf32> to vector<5x32xf32>
    %197 = arith.addf %195, %196 : vector<5x32xf32>
    %c1_137 = arith.constant 1 : index
    %c0_138 = arith.constant 0 : index
    %c0_139 = arith.constant 0 : index
    %c0_140 = arith.constant 0 : index
    %198 = vector.load %arg12[%c1_137, %c0_138, %c0_139, %c0_140] : memref<2x3x32x32xf32, #tpu.memory_space<vmem>>, vector<1x1x32x32xf32>
    %199 = vector.shape_cast %198 : vector<1x1x32x32xf32> to vector<32x32xf32>
    %cst_141 = arith.constant dense<0.000000e+00> : vector<5x32xf32>
    %200 = tpu.matmul %197, %199, %cst_141 {dimension_numbers = #tpu.dot_dimension_numbers<[1], [0], [0], [1], [0, 0, 1, 1], [], []>} : vector<5x32xf32>, vector<32x32xf32>, vector<5x32xf32> -> vector<5x32xf32>
    %c1_142 = arith.constant 1 : index
    %c0_143 = arith.constant 0 : index
    %c0_144 = arith.constant 0 : index
    %c0_145 = arith.constant 0 : index
    %201 = vector.load %arg13[%c1_142, %c0_143, %c0_144, %c0_145] : memref<2x3x1x32xf32, #tpu.memory_space<vmem>>, vector<1x1x1x32xf32>
    %202 = vector.shape_cast %201 : vector<1x1x1x32xf32> to vector<1x32xf32>
    %203 = vector.broadcast %202 : vector<1x32xf32> to vector<5x32xf32>
    %204 = arith.addf %200, %203 : vector<5x32xf32>
    %c1_146 = arith.constant 1 : index
    %c1_147 = arith.constant 1 : index
    %c0_148 = arith.constant 0 : index
    %c0_149 = arith.constant 0 : index
    %205 = vector.load %arg12[%c1_146, %c1_147, %c0_148, %c0_149] : memref<2x3x32x32xf32, #tpu.memory_space<vmem>>, vector<1x1x32x32xf32>
    %206 = vector.shape_cast %205 : vector<1x1x32x32xf32> to vector<32x32xf32>
    %cst_150 = arith.constant dense<0.000000e+00> : vector<5x32xf32>
    %207 = tpu.matmul %197, %206, %cst_150 {dimension_numbers = #tpu.dot_dimension_numbers<[1], [0], [0], [1], [0, 0, 1, 1], [], []>} : vector<5x32xf32>, vector<32x32xf32>, vector<5x32xf32> -> vector<5x32xf32>
    %c1_151 = arith.constant 1 : index
    %c1_152 = arith.constant 1 : index
    %c0_153 = arith.constant 0 : index
    %c0_154 = arith.constant 0 : index
    %208 = vector.load %arg13[%c1_151, %c1_152, %c0_153, %c0_154] : memref<2x3x1x32xf32, #tpu.memory_space<vmem>>, vector<1x1x1x32xf32>
    %209 = vector.shape_cast %208 : vector<1x1x1x32xf32> to vector<1x32xf32>
    %210 = vector.broadcast %209 : vector<1x32xf32> to vector<5x32xf32>
    %211 = arith.addf %207, %210 : vector<5x32xf32>
    %c1_155 = arith.constant 1 : index
    %c2_156 = arith.constant 2 : index
    %c0_157 = arith.constant 0 : index
    %c0_158 = arith.constant 0 : index
    %212 = vector.load %arg12[%c1_155, %c2_156, %c0_157, %c0_158] : memref<2x3x32x32xf32, #tpu.memory_space<vmem>>, vector<1x1x32x32xf32>
    %213 = vector.shape_cast %212 : vector<1x1x32x32xf32> to vector<32x32xf32>
    %cst_159 = arith.constant dense<0.000000e+00> : vector<5x32xf32>
    %214 = tpu.matmul %197, %213, %cst_159 {dimension_numbers = #tpu.dot_dimension_numbers<[1], [0], [0], [1], [0, 0, 1, 1], [], []>} : vector<5x32xf32>, vector<32x32xf32>, vector<5x32xf32> -> vector<5x32xf32>
    %c1_160 = arith.constant 1 : index
    %c2_161 = arith.constant 2 : index
    %c0_162 = arith.constant 0 : index
    %c0_163 = arith.constant 0 : index
    %215 = vector.load %arg13[%c1_160, %c2_161, %c0_162, %c0_163] : memref<2x3x1x32xf32, #tpu.memory_space<vmem>>, vector<1x1x1x32xf32>
    %216 = vector.shape_cast %215 : vector<1x1x1x32xf32> to vector<1x32xf32>
    %217 = vector.broadcast %216 : vector<1x32xf32> to vector<5x32xf32>
    %218 = arith.addf %214, %217 : vector<5x32xf32>
    %219 = arith.mulf %204, %49 : vector<5x32xf32>
    %cst_164 = arith.constant dense<0.000000e+00> : vector<5x32xf32>
    %220 = tpu.matmul %204, %51, %cst_164 {dimension_numbers = #tpu.dot_dimension_numbers<[1], [0], [0], [1], [0, 0, 1, 1], [], []>} : vector<5x32xf32>, vector<32x32xf32>, vector<5x32xf32> -> vector<5x32xf32>
    %221 = arith.mulf %220, %50 : vector<5x32xf32>
    %222 = arith.addf %219, %221 : vector<5x32xf32>
    %223 = arith.mulf %211, %49 : vector<5x32xf32>
    %cst_165 = arith.constant dense<0.000000e+00> : vector<5x32xf32>
    %224 = tpu.matmul %211, %51, %cst_165 {dimension_numbers = #tpu.dot_dimension_numbers<[1], [0], [0], [1], [0, 0, 1, 1], [], []>} : vector<5x32xf32>, vector<32x32xf32>, vector<5x32xf32> -> vector<5x32xf32>
    %225 = arith.mulf %224, %50 : vector<5x32xf32>
    %226 = arith.addf %223, %225 : vector<5x32xf32>
    %cst_166 = arith.constant 0.000000e+00 : f32
    %227 = vector.broadcast %cst_166 : f32 to vector<5x32xf32>
    %228 = arith.cmpf ogt, %222, %227 : vector<5x32xf32>
    %cst_167 = arith.constant 0.000000e+00 : f32
    %229 = vector.broadcast %cst_167 : f32 to vector<5x32xf32>
    %230 = arith.minimumf %222, %229 : vector<5x32xf32>
    %231 = math.exp %230 : vector<5x32xf32>
    %cst_168 = arith.constant 1.000000e+00 : f32
    %232 = vector.broadcast %cst_168 : f32 to vector<5x32xf32>
    %233 = arith.subf %231, %232 : vector<5x32xf32>
    %234 = arith.select %228, %222, %233 : vector<5x32xi1>, vector<5x32xf32>
    %cst_169 = arith.constant 1.000000e+00 : f32
    %235 = vector.broadcast %cst_169 : f32 to vector<5x32xf32>
    %236 = arith.addf %234, %235 : vector<5x32xf32>
    %cst_170 = arith.constant 0.000000e+00 : f32
    %237 = vector.broadcast %cst_170 : f32 to vector<5x32xf32>
    %238 = arith.cmpf ogt, %226, %237 : vector<5x32xf32>
    %cst_171 = arith.constant 0.000000e+00 : f32
    %239 = vector.broadcast %cst_171 : f32 to vector<5x32xf32>
    %240 = arith.minimumf %226, %239 : vector<5x32xf32>
    %241 = math.exp %240 : vector<5x32xf32>
    %cst_172 = arith.constant 1.000000e+00 : f32
    %242 = vector.broadcast %cst_172 : f32 to vector<5x32xf32>
    %243 = arith.subf %241, %242 : vector<5x32xf32>
    %244 = arith.select %238, %226, %243 : vector<5x32xi1>, vector<5x32xf32>
    %cst_173 = arith.constant 1.000000e+00 : f32
    %245 = vector.broadcast %cst_173 : f32 to vector<5x32xf32>
    %246 = arith.addf %244, %245 : vector<5x32xf32>
    %cst_174 = arith.constant dense<0.000000e+00> : vector<32x32xf32>
    %247 = tpu.matmul %246, %218, %cst_174 {dimension_numbers = #tpu.dot_dimension_numbers<[0], [0], [1], [1], [0, 1, 1, 1], [], []>} : vector<5x32xf32>, vector<5x32xf32>, vector<32x32xf32> -> vector<32x32xf32>
    %248 = arith.mulf %247, %52 : vector<32x32xf32>
    %cst_175 = arith.constant dense<0.000000e+00> : vector<5x32xf32>
    %249 = tpu.matmul %236, %248, %cst_175 {dimension_numbers = #tpu.dot_dimension_numbers<[1], [0], [0], [1], [0, 0, 1, 1], [], []>} : vector<5x32xf32>, vector<32x32xf32>, vector<5x32xf32> -> vector<5x32xf32>
    %cst_176 = arith.constant dense<0.000000e+00> : vector<32xf32>
    %250 = vector.multi_reduction <add>, %246, %cst_176 [0] : vector<5x32xf32> to vector<32xf32>
    %251 = vector.shape_cast %250 : vector<32xf32> to vector<1x32xf32>
    %252 = vector.broadcast %251 : vector<1x32xf32> to vector<5x32xf32>
    %253 = arith.mulf %236, %252 : vector<5x32xf32>
    %cst_177 = arith.constant dense<0.000000e+00> : vector<5x32xf32>
    %254 = tpu.matmul %253, %52, %cst_177 {dimension_numbers = #tpu.dot_dimension_numbers<[1], [0], [0], [1], [0, 0, 1, 1], [], []>} : vector<5x32xf32>, vector<32x32xf32>, vector<5x32xf32> -> vector<5x32xf32>
    %cst_178 = arith.constant 9.99999997E-7 : f32
    %255 = vector.broadcast %cst_178 : f32 to vector<5x32xf32>
    %256 = arith.addf %254, %255 : vector<5x32xf32>
    %257 = tpu.reciprocal %256 {approx = true} : vector<5x32xf32> -> vector<5x32xf32>
    %258 = arith.mulf %249, %257 : vector<5x32xf32>
    %c1_179 = arith.constant 1 : index
    %c0_180 = arith.constant 0 : index
    %c0_181 = arith.constant 0 : index
    %259 = vector.load %arg14[%c1_179, %c0_180, %c0_181] : memref<2x32x32xf32, #tpu.memory_space<vmem>>, vector<1x32x32xf32>
    %260 = vector.shape_cast %259 : vector<1x32x32xf32> to vector<32x32xf32>
    %cst_182 = arith.constant dense<0.000000e+00> : vector<5x32xf32>
    %261 = tpu.matmul %258, %260, %cst_182 {dimension_numbers = #tpu.dot_dimension_numbers<[1], [0], [0], [1], [0, 0, 1, 1], [], []>} : vector<5x32xf32>, vector<32x32xf32>, vector<5x32xf32> -> vector<5x32xf32>
    %c1_183 = arith.constant 1 : index
    %c0_184 = arith.constant 0 : index
    %c0_185 = arith.constant 0 : index
    %262 = vector.load %arg15[%c1_183, %c0_184, %c0_185] : memref<2x1x32xf32, #tpu.memory_space<vmem>>, vector<1x1x32xf32>
    %263 = vector.shape_cast %262 : vector<1x1x32xf32> to vector<1x32xf32>
    %264 = vector.broadcast %263 : vector<1x32xf32> to vector<5x32xf32>
    %265 = arith.addf %261, %264 : vector<5x32xf32>
    %266 = arith.addf %197, %265 : vector<5x32xf32>
    %c1_186 = arith.constant 1 : index
    %c0_187 = arith.constant 0 : index
    %c0_188 = arith.constant 0 : index
    %267 = vector.load %arg16[%c1_186, %c0_187, %c0_188] : memref<2x1x32xf32, #tpu.memory_space<vmem>>, vector<1x1x32xf32>
    %268 = vector.shape_cast %267 : vector<1x1x32xf32> to vector<1x32xf32>
    %c1_189 = arith.constant 1 : index
    %c0_190 = arith.constant 0 : index
    %c0_191 = arith.constant 0 : index
    %269 = vector.load %arg17[%c1_189, %c0_190, %c0_191] : memref<2x1x32xf32, #tpu.memory_space<vmem>>, vector<1x1x32xf32>
    %270 = vector.shape_cast %269 : vector<1x1x32xf32> to vector<1x32xf32>
    %cst_192 = arith.constant dense<0.000000e+00> : vector<5xf32>
    %271 = vector.multi_reduction <add>, %266, %cst_192 [1] : vector<5x32xf32> to vector<5xf32>
    %272 = vector.shape_cast %271 : vector<5xf32> to vector<5x1xf32>
    %cst_193 = arith.constant 3.200000e+01 : f32
    %273 = vector.broadcast %cst_193 : f32 to vector<5x1xf32>
    %274 = arith.divf %272, %273 : vector<5x1xf32>
    %275 = vector.broadcast %274 : vector<5x1xf32> to vector<5x32xf32>
    %276 = arith.subf %266, %275 : vector<5x32xf32>
    %277 = arith.mulf %276, %276 : vector<5x32xf32>
    %cst_194 = arith.constant dense<0.000000e+00> : vector<5xf32>
    %278 = vector.multi_reduction <add>, %277, %cst_194 [1] : vector<5x32xf32> to vector<5xf32>
    %279 = vector.shape_cast %278 : vector<5xf32> to vector<5x1xf32>
    %cst_195 = arith.constant 3.200000e+01 : f32
    %280 = vector.broadcast %cst_195 : f32 to vector<5x1xf32>
    %281 = arith.divf %279, %280 : vector<5x1xf32>
    %cst_196 = arith.constant 9.99999974E-6 : f32
    %282 = vector.broadcast %cst_196 : f32 to vector<5x1xf32>
    %283 = arith.addf %281, %282 : vector<5x1xf32>
    %284 = math.rsqrt %283 : vector<5x1xf32>
    %285 = vector.broadcast %284 : vector<5x1xf32> to vector<5x32xf32>
    %286 = arith.mulf %276, %285 : vector<5x32xf32>
    %287 = vector.broadcast %268 : vector<1x32xf32> to vector<5x32xf32>
    %288 = arith.mulf %286, %287 : vector<5x32xf32>
    %289 = vector.broadcast %270 : vector<1x32xf32> to vector<5x32xf32>
    %290 = arith.addf %288, %289 : vector<5x32xf32>
    %c1_197 = arith.constant 1 : index
    %c0_198 = arith.constant 0 : index
    %c0_199 = arith.constant 0 : index
    %291 = vector.load %arg18[%c1_197, %c0_198, %c0_199] : memref<2x32x64xf32, #tpu.memory_space<vmem>>, vector<1x32x64xf32>
    %292 = vector.shape_cast %291 : vector<1x32x64xf32> to vector<32x64xf32>
    %cst_200 = arith.constant dense<0.000000e+00> : vector<5x64xf32>
    %293 = tpu.matmul %290, %292, %cst_200 {dimension_numbers = #tpu.dot_dimension_numbers<[1], [0], [0], [1], [0, 0, 1, 1], [], []>} : vector<5x32xf32>, vector<32x64xf32>, vector<5x64xf32> -> vector<5x64xf32>
    %c1_201 = arith.constant 1 : index
    %c0_202 = arith.constant 0 : index
    %c0_203 = arith.constant 0 : index
    %294 = vector.load %arg19[%c1_201, %c0_202, %c0_203] : memref<2x1x64xf32, #tpu.memory_space<vmem>>, vector<1x1x64xf32>
    %295 = vector.shape_cast %294 : vector<1x1x64xf32> to vector<1x64xf32>
    %296 = vector.broadcast %295 : vector<1x64xf32> to vector<5x64xf32>
    %297 = arith.addf %293, %296 : vector<5x64xf32>
    %298 = arith.mulf %297, %297 : vector<5x64xf32>
    %299 = arith.mulf %297, %298 : vector<5x64xf32>
    %cst_204 = arith.constant 4.471500e-02 : f32
    %300 = vector.broadcast %cst_204 : f32 to vector<5x64xf32>
    %301 = arith.mulf %300, %299 : vector<5x64xf32>
    %302 = arith.addf %297, %301 : vector<5x64xf32>
    %cst_205 = arith.constant 0.797884583 : f32
    %303 = vector.broadcast %cst_205 : f32 to vector<5x64xf32>
    %304 = arith.mulf %303, %302 : vector<5x64xf32>
    %305 = math.tanh %304 : vector<5x64xf32>
    %cst_206 = arith.constant 1.000000e+00 : f32
    %306 = vector.broadcast %cst_206 : f32 to vector<5x64xf32>
    %307 = arith.addf %306, %305 : vector<5x64xf32>
    %cst_207 = arith.constant 5.000000e-01 : f32
    %308 = vector.broadcast %cst_207 : f32 to vector<5x64xf32>
    %309 = arith.mulf %308, %307 : vector<5x64xf32>
    %310 = arith.mulf %297, %309 : vector<5x64xf32>
    %c1_208 = arith.constant 1 : index
    %c0_209 = arith.constant 0 : index
    %c0_210 = arith.constant 0 : index
    %311 = vector.load %arg20[%c1_208, %c0_209, %c0_210] : memref<2x64x32xf32, #tpu.memory_space<vmem>>, vector<1x64x32xf32>
    %312 = vector.shape_cast %311 : vector<1x64x32xf32> to vector<64x32xf32>
    %cst_211 = arith.constant dense<0.000000e+00> : vector<5x32xf32>
    %313 = tpu.matmul %310, %312, %cst_211 {dimension_numbers = #tpu.dot_dimension_numbers<[1], [0], [0], [1], [0, 0, 1, 1], [], []>} : vector<5x64xf32>, vector<64x32xf32>, vector<5x32xf32> -> vector<5x32xf32>
    %c1_212 = arith.constant 1 : index
    %c0_213 = arith.constant 0 : index
    %c0_214 = arith.constant 0 : index
    %314 = vector.load %arg21[%c1_212, %c0_213, %c0_214] : memref<2x1x32xf32, #tpu.memory_space<vmem>>, vector<1x1x32xf32>
    %315 = vector.shape_cast %314 : vector<1x1x32xf32> to vector<1x32xf32>
    %316 = vector.broadcast %315 : vector<1x32xf32> to vector<5x32xf32>
    %317 = arith.addf %313, %316 : vector<5x32xf32>
    %318 = arith.addf %290, %317 : vector<5x32xf32>
    %c1_215 = arith.constant 1 : index
    %c0_216 = arith.constant 0 : index
    %c0_217 = arith.constant 0 : index
    %319 = vector.load %arg22[%c1_215, %c0_216, %c0_217] : memref<2x1x32xf32, #tpu.memory_space<vmem>>, vector<1x1x32xf32>
    %320 = vector.shape_cast %319 : vector<1x1x32xf32> to vector<1x32xf32>
    %c1_218 = arith.constant 1 : index
    %c0_219 = arith.constant 0 : index
    %c0_220 = arith.constant 0 : index
    %321 = vector.load %arg23[%c1_218, %c0_219, %c0_220] : memref<2x1x32xf32, #tpu.memory_space<vmem>>, vector<1x1x32xf32>
    %322 = vector.shape_cast %321 : vector<1x1x32xf32> to vector<1x32xf32>
    %cst_221 = arith.constant dense<0.000000e+00> : vector<5xf32>
    %323 = vector.multi_reduction <add>, %318, %cst_221 [1] : vector<5x32xf32> to vector<5xf32>
    %324 = vector.shape_cast %323 : vector<5xf32> to vector<5x1xf32>
    %cst_222 = arith.constant 3.200000e+01 : f32
    %325 = vector.broadcast %cst_222 : f32 to vector<5x1xf32>
    %326 = arith.divf %324, %325 : vector<5x1xf32>
    %327 = vector.broadcast %326 : vector<5x1xf32> to vector<5x32xf32>
    %328 = arith.subf %318, %327 : vector<5x32xf32>
    %329 = arith.mulf %328, %328 : vector<5x32xf32>
    %cst_223 = arith.constant dense<0.000000e+00> : vector<5xf32>
    %330 = vector.multi_reduction <add>, %329, %cst_223 [1] : vector<5x32xf32> to vector<5xf32>
    %331 = vector.shape_cast %330 : vector<5xf32> to vector<5x1xf32>
    %cst_224 = arith.constant 3.200000e+01 : f32
    %332 = vector.broadcast %cst_224 : f32 to vector<5x1xf32>
    %333 = arith.divf %331, %332 : vector<5x1xf32>
    %cst_225 = arith.constant 9.99999974E-6 : f32
    %334 = vector.broadcast %cst_225 : f32 to vector<5x1xf32>
    %335 = arith.addf %333, %334 : vector<5x1xf32>
    %336 = math.rsqrt %335 : vector<5x1xf32>
    %337 = vector.broadcast %336 : vector<5x1xf32> to vector<5x32xf32>
    %338 = arith.mulf %328, %337 : vector<5x32xf32>
    %339 = vector.broadcast %320 : vector<1x32xf32> to vector<5x32xf32>
    %340 = arith.mulf %338, %339 : vector<5x32xf32>
    %341 = vector.broadcast %322 : vector<1x32xf32> to vector<5x32xf32>
    %342 = arith.addf %340, %341 : vector<5x32xf32>
    %343 = vector.extract_strided_slice %342 {offsets = [0, 0], sizes = [1, 32], strides = [1, 1]} : vector<5x32xf32> to vector<1x32xf32>
    %c0_226 = arith.constant 0 : index
    %c0_227 = arith.constant 0 : index
    %344 = vector.load %arg24[%c0_226, %c0_227] : memref<1x32xf32, #tpu.memory_space<vmem>>, vector<1x32xf32>
    %c0_228 = arith.constant 0 : index
    %c0_229 = arith.constant 0 : index
    %345 = vector.load %arg25[%c0_228, %c0_229] : memref<1x32xf32, #tpu.memory_space<vmem>>, vector<1x32xf32>
    %cst_230 = arith.constant dense<0.000000e+00> : vector<1xf32>
    %346 = vector.multi_reduction <add>, %343, %cst_230 [1] : vector<1x32xf32> to vector<1xf32>
    %347 = vector.shape_cast %346 : vector<1xf32> to vector<1x1xf32>
    %cst_231 = arith.constant 3.200000e+01 : f32
    %348 = vector.broadcast %cst_231 : f32 to vector<1x1xf32>
    %349 = arith.divf %347, %348 : vector<1x1xf32>
    %350 = vector.broadcast %349 : vector<1x1xf32> to vector<1x32xf32>
    %351 = arith.subf %343, %350 : vector<1x32xf32>
    %352 = arith.mulf %351, %351 : vector<1x32xf32>
    %cst_232 = arith.constant dense<0.000000e+00> : vector<1xf32>
    %353 = vector.multi_reduction <add>, %352, %cst_232 [1] : vector<1x32xf32> to vector<1xf32>
    %354 = vector.shape_cast %353 : vector<1xf32> to vector<1x1xf32>
    %cst_233 = arith.constant 3.200000e+01 : f32
    %355 = vector.broadcast %cst_233 : f32 to vector<1x1xf32>
    %356 = arith.divf %354, %355 : vector<1x1xf32>
    %cst_234 = arith.constant 9.99999974E-6 : f32
    %357 = vector.broadcast %cst_234 : f32 to vector<1x1xf32>
    %358 = arith.addf %356, %357 : vector<1x1xf32>
    %359 = math.rsqrt %358 : vector<1x1xf32>
    %360 = vector.broadcast %359 : vector<1x1xf32> to vector<1x32xf32>
    %361 = arith.mulf %351, %360 : vector<1x32xf32>
    %362 = arith.mulf %361, %344 : vector<1x32xf32>
    %363 = arith.addf %362, %345 : vector<1x32xf32>
    %c0_235 = arith.constant 0 : index
    %c0_236 = arith.constant 0 : index
    %364 = vector.load %arg26[%c0_235, %c0_236] : memref<32x1xf32, #tpu.memory_space<vmem>>, vector<32x1xf32>
    %cst_237 = arith.constant dense<0.000000e+00> : vector<1x1xf32>
    %365 = tpu.matmul %363, %364, %cst_237 {dimension_numbers = #tpu.dot_dimension_numbers<[1], [0], [0], [1], [0, 0, 1, 1], [], []>} : vector<1x32xf32>, vector<32x1xf32>, vector<1x1xf32> -> vector<1x1xf32>
    %c0_238 = arith.constant 0 : index
    %c0_239 = arith.constant 0 : index
    %366 = vector.load %arg27[%c0_238, %c0_239] : memref<1x1xf32, #tpu.memory_space<vmem>>, vector<1x1xf32>
    %367 = arith.addf %365, %366 : vector<1x1xf32>
    %c0_240 = arith.constant 0 : index
    %c0_241 = arith.constant 0 : index
    %c0_242 = arith.constant 0 : index
    %368 = vector.load %arg28[%c0_240, %c0_241, %c0_242] : memref<1x1x1xf32, #tpu.memory_space<vmem>>, vector<1x1x1xf32>
    %369 = vector.shape_cast %368 : vector<1x1x1xf32> to vector<1x1xf32>
    %370 = vector.shape_cast %367 : vector<1x1xf32> to vector<1x1x1xf32>
    tpu.vector_store %arg28[%c0_240, %c0_241, %c0_242], %370 {strides = array<i32>} : memref<1x1x1xf32, #tpu.memory_space<vmem>>, vector<1x1x1xf32>,
    return
  }
  func.func @transform_0(%arg0: i32) -> (i32, i32, i32) {
    %c0_i32 = arith.constant 0 : i32
    %c0_i32_0 = arith.constant 0 : i32
    %c0_i32_1 = arith.constant 0 : i32
    return %arg0, %c0_i32, %c0_i32_0 : i32, i32, i32
  }
  func.func @transform_1(%arg0: i32) -> (i32, i32) {
    %c0_i32 = arith.constant 0 : i32
    %c0_i32_0 = arith.constant 0 : i32
    %c0_i32_1 = arith.constant 0 : i32
    return %c0_i32, %c0_i32_0 : i32, i32
  }
  func.func @transform_2(%arg0: i32) -> (i32, i32) {
    %c0_i32 = arith.constant 0 : i32
    %c0_i32_0 = arith.constant 0 : i32
    %c0_i32_1 = arith.constant 0 : i32
    return %c0_i32, %c0_i32_0 : i32, i32
  }
  func.func @transform_3(%arg0: i32) -> (i32, i32, i32) {
    %c0_i32 = arith.constant 0 : i32
    %c0_i32_0 = arith.constant 0 : i32
    %c0_i32_1 = arith.constant 0 : i32
    %c0_i32_2 = arith.constant 0 : i32
    return %c0_i32, %c0_i32_0, %c0_i32_1 : i32, i32, i32
  }
  func.func @transform_4(%arg0: i32) -> (i32, i32, i32) {
    %c0_i32 = arith.constant 0 : i32
    %c0_i32_0 = arith.constant 0 : i32
    %c0_i32_1 = arith.constant 0 : i32
    %c0_i32_2 = arith.constant 0 : i32
    return %c0_i32, %c0_i32_0, %c0_i32_1 : i32, i32, i32
  }
  func.func @transform_5(%arg0: i32) -> (i32, i32) {
    %c0_i32 = arith.constant 0 : i32
    %c0_i32_0 = arith.constant 0 : i32
    %c0_i32_1 = arith.constant 0 : i32
    return %c0_i32, %c0_i32_0 : i32, i32
  }
  func.func @transform_6(%arg0: i32) -> (i32, i32) {
    %c0_i32 = arith.constant 0 : i32
    %c0_i32_0 = arith.constant 0 : i32
    %c0_i32_1 = arith.constant 0 : i32
    return %c0_i32, %c0_i32_0 : i32, i32
  }
  func.func @transform_7(%arg0: i32) -> (i32, i32) {
    %c0_i32 = arith.constant 0 : i32
    %c0_i32_0 = arith.constant 0 : i32
    %c0_i32_1 = arith.constant 0 : i32
    return %c0_i32, %c0_i32_0 : i32, i32
  }
  func.func @transform_8(%arg0: i32) -> (i32, i32) {
    %c0_i32 = arith.constant 0 : i32
    %c0_i32_0 = arith.constant 0 : i32
    %c0_i32_1 = arith.constant 0 : i32
    return %c0_i32, %c0_i32_0 : i32, i32
  }
  func.func @transform_9(%arg0: i32) -> (i32, i32) {
    %c0_i32 = arith.constant 0 : i32
    %c0_i32_0 = arith.constant 0 : i32
    %c0_i32_1 = arith.constant 0 : i32
    return %c0_i32, %c0_i32_0 : i32, i32
  }
  func.func @transform_10(%arg0: i32) -> (i32, i32) {
    %c0_i32 = arith.constant 0 : i32
    %c0_i32_0 = arith.constant 0 : i32
    %c0_i32_1 = arith.constant 0 : i32
    return %c0_i32, %c0_i32_0 : i32, i32
  }
  func.func @transform_11(%arg0: i32) -> (i32, i32, i32, i32) {
    %c0_i32 = arith.constant 0 : i32
    %c0_i32_0 = arith.constant 0 : i32
    %c0_i32_1 = arith.constant 0 : i32
    %c0_i32_2 = arith.constant 0 : i32
    %c0_i32_3 = arith.constant 0 : i32
    return %c0_i32, %c0_i32_0, %c0_i32_1, %c0_i32_2 : i32, i32, i32, i32
  }
  func.func @transform_12(%arg0: i32) -> (i32, i32, i32, i32) {
    %c0_i32 = arith.constant 0 : i32
    %c0_i32_0 = arith.constant 0 : i32
    %c0_i32_1 = arith.constant 0 : i32
    %c0_i32_2 = arith.constant 0 : i32
    %c0_i32_3 = arith.constant 0 : i32
    return %c0_i32, %c0_i32_0, %c0_i32_1, %c0_i32_2 : i32, i32, i32, i32
  }
  func.func @transform_13(%arg0: i32) -> (i32, i32, i32) {
    %c0_i32 = arith.constant 0 : i32
    %c0_i32_0 = arith.constant 0 : i32
    %c0_i32_1 = arith.constant 0 : i32
    %c0_i32_2 = arith.constant 0 : i32
    return %c0_i32, %c0_i32_0, %c0_i32_1 : i32, i32, i32
  }
  func.func @transform_14(%arg0: i32) -> (i32, i32, i32) {
    %c0_i32 = arith.constant 0 : i32
    %c0_i32_0 = arith.constant 0 : i32
    %c0_i32_1 = arith.constant 0 : i32
    %c0_i32_2 = arith.constant 0 : i32
    return %c0_i32, %c0_i32_0, %c0_i32_1 : i32, i32, i32
  }
  func.func @transform_15(%arg0: i32) -> (i32, i32, i32) {
    %c0_i32 = arith.constant 0 : i32
    %c0_i32_0 = arith.constant 0 : i32
    %c0_i32_1 = arith.constant 0 : i32
    %c0_i32_2 = arith.constant 0 : i32
    return %c0_i32, %c0_i32_0, %c0_i32_1 : i32, i32, i32
  }
  func.func @transform_16(%arg0: i32) -> (i32, i32, i32) {
    %c0_i32 = arith.constant 0 : i32
    %c0_i32_0 = arith.constant 0 : i32
    %c0_i32_1 = arith.constant 0 : i32
    %c0_i32_2 = arith.constant 0 : i32
    return %c0_i32, %c0_i32_0, %c0_i32_1 : i32, i32, i32
  }
  func.func @transform_17(%arg0: i32) -> (i32, i32, i32) {
    %c0_i32 = arith.constant 0 : i32
    %c0_i32_0 = arith.constant 0 : i32
    %c0_i32_1 = arith.constant 0 : i32
    %c0_i32_2 = arith.constant 0 : i32
    return %c0_i32, %c0_i32_0, %c0_i32_1 : i32, i32, i32
  }
  func.func @transform_18(%arg0: i32) -> (i32, i32, i32) {
    %c0_i32 = arith.constant 0 : i32
    %c0_i32_0 = arith.constant 0 : i32
    %c0_i32_1 = arith.constant 0 : i32
    %c0_i32_2 = arith.constant 0 : i32
    return %c0_i32, %c0_i32_0, %c0_i32_1 : i32, i32, i32
  }
  func.func @transform_19(%arg0: i32) -> (i32, i32, i32) {
    %c0_i32 = arith.constant 0 : i32
    %c0_i32_0 = arith.constant 0 : i32
    %c0_i32_1 = arith.constant 0 : i32
    %c0_i32_2 = arith.constant 0 : i32
    return %c0_i32, %c0_i32_0, %c0_i32_1 : i32, i32, i32
  }
  func.func @transform_20(%arg0: i32) -> (i32, i32, i32) {
    %c0_i32 = arith.constant 0 : i32
    %c0_i32_0 = arith.constant 0 : i32
    %c0_i32_1 = arith.constant 0 : i32
    %c0_i32_2 = arith.constant 0 : i32
    return %c0_i32, %c0_i32_0, %c0_i32_1 : i32, i32, i32
  }
  func.func @transform_21(%arg0: i32) -> (i32, i32, i32) {
    %c0_i32 = arith.constant 0 : i32
    %c0_i32_0 = arith.constant 0 : i32
    %c0_i32_1 = arith.constant 0 : i32
    %c0_i32_2 = arith.constant 0 : i32
    return %c0_i32, %c0_i32_0, %c0_i32_1 : i32, i32, i32
  }
  func.func @transform_22(%arg0: i32) -> (i32, i32, i32) {
    %c0_i32 = arith.constant 0 : i32
    %c0_i32_0 = arith.constant 0 : i32
    %c0_i32_1 = arith.constant 0 : i32
    %c0_i32_2 = arith.constant 0 : i32
    return %c0_i32, %c0_i32_0, %c0_i32_1 : i32, i32, i32
  }
  func.func @transform_23(%arg0: i32) -> (i32, i32) {
    %c0_i32 = arith.constant 0 : i32
    %c0_i32_0 = arith.constant 0 : i32
    %c0_i32_1 = arith.constant 0 : i32
    return %c0_i32, %c0_i32_0 : i32, i32
  }
  func.func @transform_24(%arg0: i32) -> (i32, i32) {
    %c0_i32 = arith.constant 0 : i32
    %c0_i32_0 = arith.constant 0 : i32
    %c0_i32_1 = arith.constant 0 : i32
    return %c0_i32, %c0_i32_0 : i32, i32
  }
  func.func @transform_25(%arg0: i32) -> (i32, i32) {
    %c0_i32 = arith.constant 0 : i32
    %c0_i32_0 = arith.constant 0 : i32
    %c0_i32_1 = arith.constant 0 : i32
    return %c0_i32, %c0_i32_0 : i32, i32
  }
  func.func @transform_26(%arg0: i32) -> (i32, i32) {
    %c0_i32 = arith.constant 0 : i32
    %c0_i32_0 = arith.constant 0 : i32
    %c0_i32_1 = arith.constant 0 : i32
    return %c0_i32, %c0_i32_0 : i32, i32
  }
  func.func @transform_27(%arg0: i32) -> (i32, i32, i32) {
    %c0_i32 = arith.constant 0 : i32
    %c0_i32_0 = arith.constant 0 : i32
    %c0_i32_1 = arith.constant 0 : i32
    return %arg0, %c0_i32, %c0_i32_0 : i32, i32, i32
  }
}

</mosaic_0001>

<bundles_post_ra>
// kernel: patch_discriminator_forward.1
= control target key start
LH: loop header
LB: loop body
LE: loop exit
PB: predicated region body
PF: predicated region fallthrough
CT: control target
= control target key end

     0   :  { %s5344_s0 = inlined_call_operand.vmem [shape: f32[2,16,60], index: 0, kind: input, shape index: {}]   ;;  %s5345_s1 = inlined_call_operand.vmem [shape: f32[60,32], index: 1, kind: input, shape index: {}]   ;;  %s5346_s2 = inlined_call_operand.vmem [shape: f32[1,32], index: 2, kind: input, shape index: {}]   ;;  %s5347_s3 = inlined_call_operand.vmem [shape: f32[4,5,16], index: 3, kind: input, shape index: {}]   ;;  %s5348_s4 = inlined_call_operand.vmem [shape: f32[4,32,32], index: 4, kind: input, shape index: {}]   ;;  %s5349_s5 = inlined_call_operand.vmem [shape: f32[1,32], index: 5, kind: input, shape index: {}]   ;;  %s5350_s6 = inlined_call_operand.vmem [shape: f32[1,32], index: 6, kind: input, shape index: {}]   ;;  %s5351_s7 = inlined_call_operand.vmem [shape: f32[5,32], index: 7, kind: input, shape index: {}]   ;;  %s5352_s8 = inlined_call_operand.vmem [shape: f32[5,32], index: 8, kind: input, shape index: {}]   ;;  %s5353_s9 = inlined_call_operand.vmem [shape: f32[32,32], index: 9, kind: input, shape index: {}]   ;;  %s5354_s10 = inlined_call_operand.vmem [shape: f32[32,32], index: 10, kind: input, shape index: {}]   ;;  %s5355_s11 = inlined_call_operand.vmem [shape: f32[2,3,32,32], index: 11, kind: input, shape index: {}]   ;;  %s5356_s12 = inlined_call_operand.vmem [shape: f32[2,3,1,32], index: 12, kind: input, shape index: {}]   ;;  %s5357_s13 = inlined_call_operand.vmem [shape: f32[2,32,32], index: 13, kind: input, shape index: {}]   ;;  %s5358_s14 = inlined_call_operand.vmem [shape: f32[2,1,32], index: 14, kind: input, shape index: {}]   ;;  %s5359_s15 = inlined_call_operand.vmem [shape: f32[2,1,32], index: 15, kind: input, shape index: {}]   ;;  %s5360_s16 = inlined_call_operand.vmem [shape: f32[2,1,32], index: 16, kind: input, shape index: {}]   ;;  %s5361_s17 = inlined_call_operand.vmem [shape: f32[2,32,64], index: 17, kind: input, shape index: {}]   ;;  %s5362_s18 = inlined_call_operand.vmem [shape: f32[2,1,64], index: 18, kind: input, shape index: {}]   ;;  %s5363_s19 = inlined_call_operand.vmem [shape: f32[2,64,32], index: 19, kind: input, shape index: {}]   ;;  %s5364_s20 = inlined_call_operand.vmem [shape: f32[2,1,32], index: 20, kind: input, shape index: {}]   ;;  %s5365_s21 = inlined_call_operand.vmem [shape: f32[2,1,32], index: 21, kind: input, shape index: {}]   ;;  %s5366_s22 = inlined_call_operand.vmem [shape: f32[2,1,32], index: 22, kind: input, shape index: {}]   ;;  %s5367_s23 = inlined_call_operand.vmem [shape: f32[1,32], index: 23, kind: input, shape index: {}]   ;;  %s5368_s24 = inlined_call_operand.vmem [shape: f32[1,32], index: 24, kind: input, shape index: {}]   ;;  %s5369_s25 = inlined_call_operand.vmem [shape: f32[32,1], index: 25, kind: input, shape index: {}]   ;;  %s5370_s26 = inlined_call_operand.<no memory space> [shape: f32[1,1], index: 26, kind: input, shape index: {}]   ;;  %s5371_s27 = inlined_call_operand.vmem [shape: f32[2,1,1], index: 27, kind: output, shape index: {}]  }
   0x1   :  { %5379 = sst [smem:[#allocation3_spill]] %s5344_s0  ;;  %v32_v0 = vstv %s5370_s26 }
   0x2   :  { %5380 = sst [smem:[#allocation4_spill]] %s5345_s1  ;;  %33 = vst [vmem:[#allocation2] sm:$0x1] %v32_v0 }
   0x3   :  { %5381 = sst [smem:[#allocation5_spill]] %s5346_s2 }
   0x4   :  { %5382 = sst [smem:[#allocation6_spill]] %s5347_s3 }
   0x5   :  { %5383 = sst [smem:[#allocation7_spill]] %s5348_s4 }
   0x6   :  { %5384 = sst [smem:[#allocation8_spill]] %s5349_s5 }
   0x7   :  { %5385 = sst [smem:[#allocation9_spill]] %s5350_s6 }
   0x8   :  { %5386 = sst [smem:[#allocation10_spill]] %s5351_s7 }
   0x9   :  { %5387 = sst [smem:[#allocation11_spill]] %s5352_s8  ;;  %s4643_s8 = smov 0  }
   0xa   :  { %5388 = sst [smem:[#allocation12_spill]] %s5353_s9 }
   0xb   :  { %5389 = sst [smem:[#allocation13_spill]] %s5354_s10 }
   0xc   :  { %5390 = sst [smem:[#allocation14_spill]] %s5355_s11 }
   0xd LB: > { %s3793_s30 = sadd.s32 4294967295, %s4496_s8   ;;  %p3797_p0 = scmp.ge.s32.totalorder %s4496_s8, 1  ;;  %s4496_s8 = sphi %s4643_s8, %s39_s8  }
   0xe   : > { %p739_p1 = scmp.lt.s32.totalorder %s4496_s8, 3 }
  0x10   : > { %p740_p2 = pnand %p3797_p0, %p739_p1 }
  0x11   : > { %s5391_s28 = sld [smem:[#allocation4_spill]] (!%p740_p2)  ;;  %p809_p3 = scmp.lt.s32.totalorder (!%p740_p2), %s3793_s30, 1 }
  0x12   : > { %743 = sbr.rel (%p740_p2) target bundleno = 5906 (0x1712), region = 128  ;;  %s5392_s7 = sld [smem:[#allocation3_spill]] (!%p740_p2) }
  0x13   : > { %s5393_s3 = sld [smem:[#allocation7_spill]] (!%p740_p2) }
  0x14   : > { %s5394_s10 = sld [smem:[#allocation5_spill]] (!%p740_p2) }
  0x15   : > { %s5395_s6 = sld [smem:[#allocation6_spill]] (!%p740_p2) }
  0x16   : > { %s5396_s2 = sld [smem:[#allocation14_spill]] (!%p740_p2) }
  0x17   : > { %v826_v1 = vld [vmem:[%s5391_s28 + $0x38] sm:$0xf]  ;;  %vm841_vm0 = vcmask 1043456   ;;  %v825_v2 = vld [vmem:[%s5391_s28 + $0x30] sm:$0xff]  ;;  %v824_v3 = vld [vmem:[%s5391_s28 + $0x28] sm:$0xff]  ;;  %s5404_s30 = smov (!%p809_p3, %s3793_s30), 1  ;;  %v1534_v61 = vlaneseq }
  0x18   : > { %4100 = vmatprep.subr.msk.mxu0 %vm841_vm0, %v826_v1  ;;  %v823_v4 = vld [vmem:[%s5391_s28 + $0x20] sm:$0xff]  ;;  %s3934_s11 = sshll.u32 %s5404_s30, 4  ;;  %vm834_vm1 = vcmask 490496   ;;  %v822_v5 = vld [vmem:[%s5391_s28 + $0x18] sm:$0xff]  ;;  %v821_v7 = vld [vmem:[%s5391_s28 + $0x10] sm:$0xff]  ;;  %v4498_v11 = vmov 0.0   ;;  %s816_s1 = scalar_lea.vmem %s5371_s27, %s5404_s30 }
  0x19   : > { %4101 = vmatpush3.msk.msra.mxu0 %vm841_vm0, %v826_v1  ;;  %s813_s4 = scalar_lea.vmem %s5392_s7, %s3934_s11  ;;  %v820_v8 = vld [vmem:[%s5391_s28 + $0x8] sm:$0xff]  ;;  %v819_v9 = vld [vmem:[%s5391_s28] sm:$0xff]  ;;  %4119 = vmatprep.subr.mxu1 %v4498_v11  ;;  %vm4499_vm2 = vmmov 0   ;;  %v998_v12 = vld [vmem:[%s5393_s3 + $0x18] sm:$0xff]  ;;  %vm921_vm3 = vcmask 130048   ;;  %vm1079_vm4 = vcmask 261120  }
  0x1a   : > { %4102 = vmatprep.subr.mxu0 %v825_v2  ;;  %v817_v6 = vld [vmem:[%s813_s4] sm:$0xff]  ;;  %v818_v10 = vld [vmem:[%s813_s4 + $0x8] sm:$0xff]  ;;  %4123 = vmatprep.mubr.msk.f32.mxu1 %vm4499_vm2, %v4498_v11  ;;  %v997_v13 = vld [vmem:[%s5393_s3 + $0x10] sm:$0xff]  ;;  %v1535_v62 = vshrl.u32 %v1534_v61, 7  ;;  %s5398_s11 = sld [smem:[#allocation9_spill]]  ;;  %vm2026_vm6 = vcmask 1044480  }
  0x1b   : > { %4103 = vmatpush3.msra.mxu0 %v825_v2  ;;  %4116 = vmatprep.mubr.msk.f32.mxu0 %vm834_vm1, %v817_v6  ;;  %v996_v14 = vld [vmem:[%s5393_s3 + $0x8] sm:$0xff]  ;;  %v3800_v15 = vld [vmem:[%s5394_s10] ss:$0 sm:$0xff]  ;;  %v3810_v22 = vld [vmem:[%s5393_s3 + $0x38] sm:$0xff]  ;;  %s5397_s10 = sld [smem:[#allocation8_spill]]  ;;  %vm2192_vm8 = vcmask 258048  }
  0x1c   : > { %4104 = vmatprep.subr.mxu0 %v824_v3  ;;  %v920_v20 = vld [vmem:[%s5395_s6] sm:$0x1f]  ;;  %v3805_v21 = vld [vmem:[%s5395_s6 + $0x8] sm:$0x1f]  ;;  %v3809_v23 = vld [vmem:[%s5393_s3 + $0x30] sm:$0xff]  ;;  %vm1536_vm5 = vcmp.eq.s32.totalorder %v1535_v62, 0 }
  0x1d   : > { %4105 = vmatpush3.msra.mxu0 %v824_v3  ;;  %v995_v24 = vld [vmem:[%s5393_s3] sm:$0xff]  ;;  %v3808_v25 = vld [vmem:[%s5393_s3 + $0x28] sm:$0xff]  ;;  %v3813_v31 = vld [vmem:[%s5395_s6 + $0x10] sm:$0x1f]  ;;  %s5400_s26 = sld [smem:[#allocation10_spill]]  ;;  %vm2013_vm9 = vcmask 39936  }
  0x1e   : > { %4106 = vmatprep.subr.mxu0 %v823_v4  ;;  %v3807_v26 = vld [vmem:[%s5393_s3 + $0x20] sm:$0xff]  ;;  %v3818_v32 = vld [vmem:[%s5393_s3 + $0x58] sm:$0xff]  ;;  %v3817_v33 = vld [vmem:[%s5393_s3 + $0x50] sm:$0xff]  ;;  %s5401_s29 = sld [smem:[#allocation11_spill]]  ;;  %vm2499_vm11 = vcmask 523264   ;;  %vm3650_vm14 = vcmask 253952  }
  0x1f   : > { %4107 = vmatpush3.msra.mxu0 %v823_v4  ;;  %v3816_v34 = vld [vmem:[%s5393_s3 + $0x48] sm:$0xff]  ;;  %v3815_v35 = vld [vmem:[%s5393_s3 + $0x40] sm:$0xff]  ;;  %v3825_v36 = vld [vmem:[%s5393_s3 + $0x78] sm:$0xff]  ;;  %s5402_s7 = sld [smem:[#allocation13_spill]]  ;;  %vm3744_vm15 = vcmask 0  }
  0x20   : > { %4108 = vmatprep.subr.mxu0 %v822_v5  ;;  %v3820_v44 = vld [vmem:[%s5395_s6 + $0x18] sm:$0x1f]  ;;  %v3824_v45 = vld [vmem:[%s5393_s3 + $0x70] sm:$0xff]  ;;  %v3823_v46 = vld [vmem:[%s5393_s3 + $0x68] sm:$0xff] }
  0x21   : > { %4109 = vmatpush3.msra.mxu0 %v822_v5  ;;  %v3822_v47 = vld [vmem:[%s5393_s3 + $0x60] sm:$0xff]  ;;  %v1568_v48 = vld [vmem:[%s5396_s2 + $0x18] sm:$0xff]  ;;  %v1567_v49 = vld [vmem:[%s5396_s2 + $0x10] sm:$0xff]  ;;  %s5399_s3 = sld [smem:[#allocation12_spill]] }
  0x22   : > { %4110 = vmatprep.subr.mxu0 %v821_v7  ;;  %v3834_v53 = vld [vmem:[%s5396_s2 + $0x38] sm:$0xff]  ;;  %v3833_v56 = vld [vmem:[%s5396_s2 + $0x30] sm:$0xff]  ;;  %v1566_v57 = vld [vmem:[%s5396_s2 + $0x8] sm:$0xff] }
  0x23   : > { %4111 = vmatpush3.msra.mxu0 %v821_v7  ;;  %v3832_v58 = vld [vmem:[%s5396_s2 + $0x28] sm:$0xff]  ;;  %v1565_v59 = vld [vmem:[%s5396_s2] sm:$0xff]  ;;  %v3841_v6 = vld [vmem:[%s5396_s2 + $0x58] sm:$0xff] }
  0x24   : > { %4112 = vmatprep.subr.mxu0 %v820_v8  ;;  %v3831_v60 = vld [vmem:[%s5396_s2 + $0x20] sm:$0xff] }
  0x25   : > { %4113 = vmatpush3.msra.mxu0 %v820_v8  ;;  %v3827_v63 = vld [vmem:[%s5397_s10] ss:$0 sm:$0xff]  ;;  %v3840_v8 = vld [vmem:[%s5396_s2 + $0x50] sm:$0xff] }
  0x26   : > { %4114 = vmatprep.subr.mxu0 %v819_v9  ;;  %v3828_v0 = vld [vmem:[%s5398_s11] ss:$0 sm:$0xff] }
  0x27   : > { %4115 = vmatpush3.msra.mxu0 %v819_v9  ;;  %v1553_v2 = vsel %vm1536_vm5, %v3827_v63, %v3828_v0  ;;  %v4858_v7 = vld [vmem:[%s5399_s3 + $0x18] sm:$0xff]  ;;  %v4872_v9 = vld [vmem:[%s5399_s3 + $0x10] sm:$0xff]  ;;  %v4971_v61 = vld [vmem:[%s5402_s7] sm:$0xff] }
  0x28   : > { %4117 = vmatmul.mubr.msk.f32.vlgmr.msra.gmra.mxu0 %vm834_vm1, %v818_v10  ;;  %4144 = vmatprep.subr.mxu0 %v4498_v11  ;;  %v3839_v10 = vld [vmem:[%s5396_s2 + $0x48] sm:$0xff] }
  0x29   : > { %4152 = vmatprep.mubr.msk.f32.mxu0 %vm4499_vm2, %v4498_v11  ;;  %4145 = vmatpush3.msra.mxu0 %v998_v12  ;;  %v3838_v12 = vld [vmem:[%s5396_s2 + $0x40] sm:$0xff] }
  0x2a   : > { %4146 = vmatprep.subr.mxu0 %v4498_v11 }
  0x2b   : > { %4147 = vmatpush3.msra.mxu0 %v997_v13  ;;  %v4901_v13 = vld [vmem:[%s5399_s3 + $0x8] sm:$0xff] }
  0x2c   : > { %4148 = vmatprep.subr.mxu0 %v4498_v11 }
  0x2d   : > { %4149 = vmatpush3.msra.mxu0 %v996_v14  ;;  %v4910_v14 = vld [vmem:[%s5399_s3] sm:$0xff] }
  0x2e   : > { %4150 = vmatprep.subr.mxu0 %v4498_v11 }
  0x2f   : > { %4151 = vmatpush3.msra.mxu0 %v995_v24 }
  0x30   : > { %4180 = vmatprep.subr.mxu0 %v4498_v11 }
  0xe8   : > { %v4118_v16 = vpop.f32.mrf.mxu0 }
  0xe9   : > { %v4704_v17 = vadd.f32 %v4118_v16, %v3800_v15  ;;  %v3836_v16 = vld [vmem:[%s5356_s12 + $0x1] ss:$0 sm:$0xff] }
  0xea   : > { %v911_v18 = vpop.f32.mrf.mxu0 }
  0xeb   : > { %v4706_v19 = vadd.f32 %v3800_v15, %v911_v18  ;;  %4120 = vmatpush3.msra.mxu1 %v4704_v17  ;;  %v3829_v15 = vld [vmem:[%s5356_s12] ss:$0 sm:$0xff] }
  0xec   : > { %4121 = vmatprep.subr.mxu1 %v4498_v11 }
  0xed   : > { %4122 = vmatpush3.msra.mxu1 %v4706_v19 }
  0xee   : > { %4124 = vmatmul.mubr.msk.f32.vlgmr.msra.gmra.mxu1 %vm921_vm3, %v920_v20  ;;  %4126 = vmatprep.subr.mxu1 %v4498_v11 }
  0xef   : > { %4127 = vmatpush3.msra.mxu1 %v4704_v17  ;;  %4130 = vmatprep.mubr.msk.f32.mxu1 %vm4499_vm2, %v4498_v11 }
  0xf0   : > { %4128 = vmatprep.subr.mxu1 %v4498_v11 }
  0xf1   : > { %4129 = vmatpush3.msra.mxu1 %v4706_v19 }
  0xf2   : > { %4131 = vmatmul.mubr.msk.f32.vlgmr.msra.gmra.mxu1 %vm921_vm3, %v3805_v21  ;;  %4133 = vmatprep.subr.mxu1 %v4498_v11 }
  0xf3   : > { %4134 = vmatpush3.msra.mxu1 %v3810_v22  ;;  %4141 = vmatprep.mubr.msk.f32.mxu1 %vm4499_vm2, %v4498_v11 }
  0xf4   : > { %4135 = vmatprep.subr.mxu1 %v4498_v11 }
  0xf5   : > { %4136 = vmatpush3.msra.mxu1 %v3809_v23  ;;  %v3843_v23 = vld [vmem:[%s5356_s12 + $0x2] ss:$0 sm:$0xff] }
  0xf6   : > { %4137 = vmatprep.subr.mxu1 %v4498_v11 }
  0xf7   : > { %4138 = vmatpush3.msra.mxu1 %v3808_v25 }
  0xf8   : > { %4139 = vmatprep.subr.mxu1 %v4498_v11 }
  0xf9   : > { %4140 = vmatpush3.msra.mxu1 %v3807_v26 }
  0xfa   : > { %4155 = vmatprep.subr.mxu1 %v4498_v11 }
 0x1ae   : > { %v991_v27 = vpop.f32.mrf.mxu1 }
 0x1af   : > { %4153 = vmatmul.mubr.msk.f32.vlgmr.msra.gmra.mxu0 %vm1079_vm4, %v991_v27  ;;  %v4934_v27 = vld [vmem:[%s5400_s26] sm:$0x1f] }
 0x1b0   : > { %v4125_v28 = vpop.f32.mrf.mxu1  ;;  %4188 = vmatprep.mubr.msk.f32.mxu0 %vm4499_vm2, %v4498_v11  ;;  %4181 = vmatpush3.msra.mxu0 %v3825_v36 }
 0x1b1   : > { %4182 = vmatprep.subr.mxu0 %v4498_v11  ;;  %v4939_v28 = vld [vmem:[%s5401_s29] sm:$0x1f] }
 0x1b2   : > { %v1070_v29 = vpop.f32.mrf.mxu1  ;;  %4183 = vmatpush3.msra.mxu0 %v3824_v45 }
 0x1b3   : > { %4142 = vmatmul.mubr.msk.f32.vlgmr.msra.gmra.mxu1 %vm1079_vm4, %v1070_v29  ;;  %4184 = vmatprep.subr.mxu0 %v4498_v11 }
 0x1b4   : > { %4156 = vmatpush3.msra.mxu1 %v4704_v17  ;;  %v4132_v30 = vpop.f32.mrf.mxu1  ;;  %4159 = vmatprep.mubr.msk.f32.mxu1 %vm4499_vm2, %v4498_v11 }
 0x1b5   : > { %4157 = vmatprep.subr.mxu1 %v4498_v11  ;;  %4185 = vmatpush3.msra.mxu0 %v3823_v46 }
 0x1b6   : > { %4158 = vmatpush3.msra.mxu1 %v4706_v19  ;;  %4186 = vmatprep.subr.mxu0 %v4498_v11 }
 0x1b7   : > { %4160 = vmatmul.mubr.msk.f32.vlgmr.msra.gmra.mxu1 %vm921_vm3, %v3813_v31  ;;  %4162 = vmatprep.subr.mxu1 %v4498_v11 }
 0x1b8   : > { %4170 = vmatprep.mubr.msk.f32.mxu1 %vm4499_vm2, %v4498_v11  ;;  %4163 = vmatpush3.msra.mxu1 %v3818_v32 }
 0x1b9   : > { %4164 = vmatprep.subr.mxu1 %v4498_v11  ;;  %4187 = vmatpush3.msra.mxu0 %v3822_v47 }
 0x1ba   : > { %4165 = vmatpush3.msra.mxu1 %v3817_v33  ;;  %4202 = vmatprep.subr.mxu0 %v4498_v11 }
 0x1bb   : > { %4166 = vmatprep.subr.mxu1 %v4498_v11 }
 0x1bc   : > { %4167 = vmatpush3.msra.mxu1 %v3816_v34 }
 0x1bd   : > { %4168 = vmatprep.subr.mxu1 %v4498_v11 }
 0x1be   : > { %4169 = vmatpush3.msra.mxu1 %v3815_v35 }
 0x1bf   : > { %4173 = vmatprep.subr.mxu1 %v4498_v11 }
 0x26f   : > { %v1222_v37 = vpop.f32.mrf.mxu0 }
 0x271   : > { %v4154_v38 = vpop.f32.mrf.mxu0 }
 0x273   : > { %v1149_v39 = vpop.f32.mrf.mxu1 }
 0x274   : > { %v1223_v40 = vadd.f32 %v1222_v37, %v1149_v39 }
 0x275   : > { %v4143_v41 = vpop.f32.mrf.mxu1 }
 0x277   : > { %v1297_v42 = vpop.f32.mrf.mxu1 }
 0x278   : > { %4171 = vmatmul.mubr.msk.f32.vlgmr.msra.gmra.mxu1 %vm1079_vm4, %v1297_v42 }
 0x279   : > { %4174 = vmatpush3.msra.mxu1 %v4704_v17  ;;  %v4161_v43 = vpop.f32.mrf.mxu1  ;;  %4177 = vmatprep.mubr.msk.f32.mxu1 %vm4499_vm2, %v4498_v11 }
 0x27a   : > { %4175 = vmatprep.subr.mxu1 %v4498_v11 }
 0x27b   : > { %4176 = vmatpush3.msra.mxu1 %v4706_v19 }
 0x27c   : > { %4178 = vmatmul.mubr.msk.f32.vlgmr.msra.gmra.mxu1 %vm921_vm3, %v3820_v44  ;;  %4191 = vmatprep.subr.mxu1 %v4498_v11 }
 0x27d   : > { %4199 = vmatprep.mubr.msk.f32.mxu1 %vm4499_vm2, %v4498_v11  ;;  %4192 = vmatpush3.msra.mxu1 %v1568_v48 }
 0x27e   : > { %4193 = vmatprep.subr.mxu1 %v4498_v11 }
 0x27f   : > { %4194 = vmatpush3.msra.mxu1 %v1567_v49 }
 0x280   : > { %4195 = vmatprep.subr.mxu1 %v4498_v11 }
 0x281   : > { %4196 = vmatpush3.msra.mxu1 %v1566_v57 }
 0x282   : > { %4197 = vmatprep.subr.mxu1 %v4498_v11 }
 0x283   : > { %4198 = vmatpush3.msra.mxu1 %v1565_v59  ;;  %v4963_v59 = vld [vmem:[%s5402_s7 + $0x8] sm:$0xff] }
 0x284   : > { %4213 = vmatprep.subr.mxu1 %v4498_v11 }
 0x338   : > { %v1375_v50 = vpop.f32.mrf.mxu1 }
 0x339   : > { %v1379_v51 = vadd.f32 %v1375_v50, %v1223_v40 }
 0x33a   : > { %v4172_v52 = vpop.f32.mrf.mxu1 }
 0x33c   : > { %v1451_v54 = vpop.f32.mrf.mxu1 }
 0x33d   : > { %4189 = vmatmul.mubr.msk.f32.vlgmr.msra.gmra.mxu0 %vm1079_vm4, %v1451_v54  ;;  %v4950_v54 = vld [vmem:[%s5402_s7 + $0x18] sm:$0xff] }
 0x33e   : > { %v4179_v55 = vpop.f32.mrf.mxu1  ;;  %4203 = vmatpush3.msra.mxu0 %v3834_v53  ;;  %4210 = vmatprep.mubr.msk.f32.mxu0 %vm4499_vm2, %v4498_v11 }
 0x33f   : > { %4204 = vmatprep.subr.mxu0 %v4498_v11 }
 0x340   : > { %4205 = vmatpush3.msra.mxu0 %v3833_v56  ;;  %v4956_v56 = vld [vmem:[%s5402_s7 + $0x10] sm:$0xff] }
 0x341   : > { %4206 = vmatprep.subr.mxu0 %v4498_v11 }
 0x342   : > { %4207 = vmatpush3.msra.mxu0 %v3832_v58 }
 0x343   : > { %4208 = vmatprep.subr.mxu0 %v4498_v11 }
 0x344   : > { %4209 = vmatpush3.msra.mxu0 %v3831_v60 }
 0x345   : > { %4224 = vmatprep.subr.mxu0 %v4498_v11 }
 0x3fd   : > { %v1529_v1 = vpop.f32.mrf.mxu0 }
 0x3fe   : > { %v1533_v3 = vadd.f32 %v1529_v1, %v1379_v51 }
 0x3ff   : > { %v4190_v4 = vpop.f32.mrf.mxu0 }
 0x400   : > { %v4850_v5 = vadd.f32 %v1553_v2, %v1533_v3 }
 0x402   : > { %4200 = vmatmul.mubr.msk.f32.vlgmr.msra.gmra.mxu1 %vm1079_vm4, %v4850_v5  ;;  %4211 = vmatmul.mubr.msk.f32.vlgmr.msra.gmra.mxu0 %vm1079_vm4, %v4850_v5 }
 0x403   : > { %4214 = vmatpush3.msra.mxu1 %v3841_v6  ;;  %4221 = vmatprep.mubr.msk.f32.mxu1 %vm4499_vm2, %v4498_v11 }
 0x404   : > { %4215 = vmatprep.subr.mxu1 %v4498_v11  ;;  %4225 = vmatpush3.msra.mxu0 %v4858_v7 }
 0x405   : > { %4216 = vmatpush3.msra.mxu1 %v3840_v8  ;;  %4226 = vmatprep.subr.mxu0 %v4498_v11 }
 0x406   : > { %4217 = vmatprep.subr.mxu1 %v4498_v11  ;;  %4227 = vmatpush3.msra.mxu0 %v4872_v9 }
 0x407   : > { %4218 = vmatpush3.msra.mxu1 %v3839_v10  ;;  %4228 = vmatprep.subr.mxu0 %v4498_v11 }
 0x408   : > { %4219 = vmatprep.subr.mxu1 %v4498_v11  ;;  %4232 = vmatprep.mubr.msk.f32.mxu0 %vm4499_vm2, %v4498_v11 }
 0x409   : > { %4220 = vmatpush3.msra.mxu1 %v3838_v12  ;;  %4229 = vmatpush3.msra.mxu0 %v4901_v13 }
 0x40a   : > { %4222 = vmatmul.mubr.msk.f32.vlgmr.msra.gmra.mxu1 %vm1079_vm4, %v4850_v5  ;;  %4235 = vmatprep.subr.mxu1 %v4498_v11 }
 0x40b   : > { %4236 = vmatpush3.msra.mxu1 %v4858_v7  ;;  %4243 = vmatprep.mubr.msk.f32.mxu1 %vm4499_vm2, %v4498_v11 }
 0x40c   : > { %4237 = vmatprep.subr.mxu1 %v4498_v11  ;;  %4230 = vmatprep.subr.mxu0 %v4498_v11 }
 0x40d   : > { %4238 = vmatpush3.msra.mxu1 %v4872_v9  ;;  %4231 = vmatpush3.msra.mxu0 %v4910_v14 }
 0x40e   : > { %4239 = vmatprep.subr.mxu1 %v4498_v11 }
 0x40f   : > { %4240 = vmatpush3.msra.mxu1 %v4901_v13 }
 0x410   : > { %4241 = vmatprep.subr.mxu1 %v4498_v11 }
 0x411   : > { %4242 = vmatpush3.msra.mxu1 %v4910_v14 }
 0x412   : > { %4254 = vmatprep.subr.mxu1 %v4498_v11 }
 0x4c2   : > { %v1645_v17 = vpop.f32.mrf.mxu1  ;;  %v1728_v18 = vpop.f32.mrf.mxu0 }
 0x4c3   : > { %v1646_v19 = vadd.f32 %v3829_v15, %v1645_v17  ;;  %v1729_v20 = vadd.f32 %v3836_v16, %v1728_v18 }
 0x4c4   : > { %v4201_v21 = vpop.f32.mrf.mxu1  ;;  %v4212_v22 = vpop.f32.mrf.mxu0 }
 0x4c5   : > { %4233 = vmatmul.mubr.msk.f32.vlgmr.msra.gmra.mxu0 %vm1079_vm4, %v1646_v19  ;;  %4244 = vmatmul.mubr.msk.f32.vlgmr.msra.gmra.mxu1 %vm1079_vm4, %v1729_v20  ;;  %v1815_v31 = vmul.f32 %v1646_v19, %v4934_v27  ;;  %v1891_v32 = vmul.f32 %v1729_v20, %v4934_v27  ;;  %v2279_v19 = vld [vmem:[%s5357_s13 + $0x18] sm:$0xff]  ;;  %v2278_v20 = vld [vmem:[%s5357_s13 + $0x10] sm:$0xff]  ;;  %v2277_v21 = vld [vmem:[%s5357_s13 + $0x8] sm:$0xff] }
 0x4c6   : > { %4262 = vmatprep.mubr.msk.f32.mxu1 %vm4499_vm2, %v4498_v11  ;;  %v2276_v22 = vld [vmem:[%s5357_s13] sm:$0xff] }
 0x4ca   : > { %v1811_v24 = vpop.f32.mrf.mxu1 }
 0x4cb   : > { %v1812_v25 = vadd.f32 %v3843_v23, %v1811_v24 }
 0x4cc   : > { %v4223_v26 = vpop.f32.mrf.mxu1 }
 0x4cd   : > { %4246 = vmatprep.subr.msk.mxu0 %vm2026_vm6, %v1812_v25 }
 0x4ce   : > { %4247 = vmatpush3.msk.msra.mxu0 %vm2026_vm6, %v1812_v25 }
 0x4cf   : > { %4265 = vmatprep.subr.mxu0 %v4498_v11 }
 0x585   : > { %v1885_v29 = vpop.f32.mrf.mxu0  ;;  %v1961_v30 = vpop.f32.mrf.mxu1 }
 0x586   : > { %v1889_v33 = vmul.f32 %v1885_v29, %v4939_v28  ;;  %v1965_v34 = vmul.f32 %v1961_v30, %v4939_v28  ;;  %v3856_v30 = vld [vmem:[%s5358_s14] ss:$0 sm:$0xff] }
 0x587   : > { %v4234_v35 = vpop.f32.mrf.mxu0  ;;  %v4245_v36 = vpop.f32.mrf.mxu1 }
 0x588   : > { %v1890_v37 = vadd.f32 %v1889_v33, %v1815_v31  ;;  %v1966_v38 = vadd.f32 %v1965_v34, %v1891_v32 }
 0x58a   : > { %v1975_v39 = vmin.f32 %v1966_v38, 0.0  ;;  %vm1974_vm7 = vcmp.gt.f32.partialorder %v1966_v38, 0.0  ;;  %v1968_v45 = vmin.f32 %v1890_v37, 0.0  ;;  %vm1967_vm10 = vcmp.gt.f32.partialorder %v1890_v37, 0.0 }
 0x58c   : > { %v1976_v40 = vmul.f32 1.442695, %v1975_v39  ;;  %v1969_v46 = vmul.f32 1.442695, %v1968_v45 }
 0x58e   : > { %4464 = vpow2.f32 %v1976_v40 }
 0x58f   : > { %4466 = vpow2.f32 %v1969_v46 }
 0x59b   : > { %v4465_v41 = vpop.eup %4464 }
 0x59c   : > { %v3848_v42 = vadd.f32 -1.0, %v4465_v41  ;;  %v4467_v52 = vpop.eup %4466  ;;  %v2394_v41 = vld [vmem:[%s5361_s17 + $0x18] sm:$0xff] }
 0x59d   : > { %v3847_v57 = vadd.f32 -1.0, %v4467_v52 }
 0x59e   : > { %v1979_v43 = vsel %vm1974_vm7, %v1966_v38, %v3848_v42  ;;  %v2392_v42 = vld [vmem:[%s5361_s17 + $0x8] sm:$0xff] }
 0x59f   : > { %v1980_v44 = vadd.f32 1.0, %v1979_v43  ;;  %v1972_v62 = vsel %vm1967_vm10, %v1890_v37, %v3847_v57  ;;  %v2391_v43 = vld [vmem:[%s5361_s17] sm:$0xff]  ;;  %v2489_v57 = vld [vmem:[%s5363_s19 + $0x28] sm:$0xff] }
 0x5a0   : > { %v1973_v1 = vadd.f32 1.0, %v1972_v62  ;;  %v2486_v62 = vld [vmem:[%s5363_s19 + $0x10] sm:$0xff] }
 0x5a1   : > { %1981 = vxpose.xlu0.b32.start.end [1/1] (short) (narrow) %v1980_v44, 32  ;;  %v2193_v47 = vsel %vm2192_vm8, %v1980_v44, 0.0 }
 0x5a2   : > { %v2194_v48 = vrot.slane %v2193_v47, 4 }
 0x5a4   : > { %v2195_v49 = vadd.f32 %v2194_v48, %v2193_v47  ;;  %v3858_v48 = vld [vmem:[%s5359_s15] ss:$0 sm:$0xff] }
 0x5a6   : > { %v2196_v50 = vrot.slane %v2195_v49, 2 }
 0x5a8   : > { %v2197_v53 = vadd.f32 %v2196_v50, %v2195_v49  ;;  %v3859_v50 = vld [vmem:[%s5360_s16] ss:$0 sm:$0xff] }
 0x5aa   : > { %v2198_v58 = vrot.slane %v2197_v53, 1 }
 0x5ac   : > { %v2199_v63 = vadd.f32 %v2198_v58, %v2197_v53  ;;  %v2491_v53 = vld [vmem:[%s5363_s19 + $0x38] sm:$0xff]  ;;  %v2488_v58 = vld [vmem:[%s5363_s19 + $0x20] sm:$0xff] }
 0x5ae   : > { %v2200_v2 = vmul.f32 %v2199_v63, %v1973_v1  ;;  %v2485_v63 = vld [vmem:[%s5363_s19 + $0x8] sm:$0xff] }
 0x61d   : > { %v1997_v51 = vpop.trf.xlu0 }
 0x61e   : > { %4248 = vmatprep.mubr.msk.f32.mxu0 %vm2013_vm9, %v1997_v51 }
 0x621   : > { %v1998_v55 = vpop.trf.xlu0 }
 0x622   : > { %4249 = vmatmul.mubr.msk.f32.vlgmr.msra.gmra.mxu0 %vm2013_vm9, %v1998_v55  ;;  %v2490_v55 = vld [vmem:[%s5363_s19 + $0x30] sm:$0xff] }
 0x623   : > { %4266 = vmatpush3.msra.mxu0 %v4950_v54 }
 0x624   : > { %4267 = vmatprep.subr.mxu0 %v4498_v11 }
 0x625   : > { %v1999_v60 = vpop.trf.xlu0  ;;  %4268 = vmatpush3.msra.mxu0 %v4956_v56 }
 0x626   : > { %4251 = vmatprep.mubr.msk.f32.mxu0 %vm2013_vm9, %v1999_v60  ;;  %4269 = vmatprep.subr.mxu0 %v4498_v11  ;;  %v2487_v60 = vld [vmem:[%s5363_s19 + $0x18] sm:$0xff] }
 0x627   : > { %4270 = vmatpush3.msra.mxu0 %v4963_v59 }
 0x628   : > { %4271 = vmatprep.subr.mxu0 %v4498_v11 }
 0x629   : > { %v2000_v0 = vpop.trf.xlu0  ;;  %4272 = vmatpush3.msra.mxu0 %v4971_v61 }
 0x62a   : > { %4252 = vmatmul.mubr.msk.f32.gmra.mxu0 %vm2013_vm9, %v2000_v0  ;;  %4287 = vmatprep.subr.mxu0 %v4498_v11  ;;  %v2484_v0 = vld [vmem:[%s5363_s19] sm:$0xff] }
 0x62b   : > { %4273 = vmatprep.mubr.msk.f32.mxu0 %vm4499_vm2, %v4498_v11 }
 0x62e   : > { %4274 = vmatmul.mubr.msk.f32.vlgmr.msra.gmra.mxu0 %vm1079_vm4, %v2200_v2 }
 0x62f   : > { %4295 = vmatprep.mubr.msk.f32.mxu0 %vm4499_vm2, %v4498_v11  ;;  %4288 = vmatpush3.msra.mxu0 %v2394_v41 }
 0x630   : > { %4289 = vmatprep.subr.mxu0 %v4498_v11 }
 0x6e2   : > { %v4250_v3 = vpop.f32.mrf.mxu0 }
 0x6e3   : > { %v2116_v16 = vmul.f32 %v4250_v3, %v4963_v59 }
 0x6e4   : > { %v2096_v4 = vpop.f32.mrf.mxu0 }
 0x6e5   : > { %v2115_v18 = vmul.f32 %v2096_v4, %v4971_v61 }
 0x6ea   : > { %v4253_v6 = vpop.f32.mrf.mxu0 }
 0x6eb   : > { %v2118_v8 = vmul.f32 %v4253_v6, %v4950_v54 }
 0x6ec   : > { %v2106_v10 = vpop.f32.mrf.mxu0 }
 0x6ed   : > { %v2117_v12 = vmul.f32 %v2106_v10, %v4956_v56  ;;  %4255 = vmatpush3.msra.mxu1 %v2118_v8 }
 0x6ee   : > { %4256 = vmatprep.subr.mxu1 %v4498_v11  ;;  %v2270_v15 = vpop.f32.mrf.mxu0 }
 0x6ef   : > { %4257 = vmatpush3.msra.mxu1 %v2117_v12  ;;  %v2271_v23 = vadd.f32 1e-06, %v2270_v15 }
 0x6f0   : > { %4258 = vmatprep.subr.mxu1 %v4498_v11  ;;  %v4275_v17 = vpop.f32.mrf.mxu0 }
 0x6f1   : > { %4259 = vmatpush3.msra.mxu1 %v2116_v16  ;;  %4468 = vrcp.f32 %v2271_v23 }
 0x6f2   : > { %4260 = vmatprep.subr.mxu1 %v4498_v11 }
 0x6f3   : > { %4261 = vmatpush3.msra.mxu1 %v2115_v18 }
 0x6f4   : > { %4263 = vmatmul.mubr.msk.f32.vlgmr.msra.gmra.mxu1 %vm1079_vm4, %v1973_v1  ;;  %4276 = vmatprep.subr.mxu1 %v4498_v11  ;;  %v3860_v1 = vld [vmem:[%s5362_s18] ss:$0 sm:$0xff] }
 0x6f5   : > { %4277 = vmatpush3.msra.mxu1 %v2279_v19  ;;  %4284 = vmatprep.mubr.msk.f32.mxu1 %vm4499_vm2, %v4498_v11 }
 0x6f6   : > { %4278 = vmatprep.subr.mxu1 %v4498_v11 }
 0x6f7   : > { %4279 = vmatpush3.msra.mxu1 %v2278_v20  ;;  %v3862_v20 = vld [vmem:[%s5364_s20] ss:$0 sm:$0xff] }
 0x6f8   : > { %4280 = vmatprep.subr.mxu1 %v4498_v11 }
 0x6f9   : > { %4281 = vmatpush3.msra.mxu1 %v2277_v21 }
 0x6fa   : > { %4282 = vmatprep.subr.mxu1 %v4498_v11 }
 0x6fb   : > { %4283 = vmatpush3.msra.mxu1 %v2276_v22 }
 0x6fc   : > { %4298 = vmatprep.subr.mxu1 %v4498_v11 }
 0x6fe   : > { %v4469_v24 = vpop.eup %4468 }
 0x7b4   : > { %v2188_v25 = vpop.f32.mrf.mxu1 }
 0x7b5   : > { %v2275_v26 = vmul.f32 %v4469_v24, %v2188_v25 }
 0x7b6   : > { %v4264_v29 = vpop.f32.mrf.mxu1 }
 0x7b7   : > { %4285 = vmatmul.mubr.msk.f32.vlgmr.msra.gmra.mxu1 %vm1079_vm4, %v2275_v26 }
 0x7b8   : > { %4314 = vmatprep.mubr.msk.f32.mxu1 %vm4499_vm2, %v4498_v11  ;;  %4299 = vmatpush3.msra.mxu1 %v2491_v53 }
 0x7b9   : > { %4300 = vmatprep.subr.mxu1 %v4498_v11 }
 0x7ba   : > { %4301 = vmatpush3.msra.mxu1 %v2490_v55 }
 0x7bb   : > { %4302 = vmatprep.subr.mxu1 %v4498_v11 }
 0x7bc   : > { %4303 = vmatpush3.msra.mxu1 %v2489_v57 }
 0x7bd   : > { %4304 = vmatprep.subr.mxu1 %v4498_v11 }
 0x7be   : > { %4305 = vmatpush3.msra.mxu1 %v2488_v58 }
 0x7bf   : > { %4306 = vmatprep.subr.mxu1 %v4498_v11 }
 0x7c0   : > { %4307 = vmatpush3.msra.mxu1 %v2487_v60 }
 0x7c1   : > { %4308 = vmatprep.subr.mxu1 %v4498_v11 }
 0x7c2   : > { %4309 = vmatpush3.msra.mxu1 %v2486_v62 }
 0x7c3   : > { %4310 = vmatprep.subr.mxu1 %v4498_v11 }
 0x7c4   : > { %4311 = vmatpush3.msra.mxu1 %v2485_v63 }
 0x7c5   : > { %4312 = vmatprep.subr.mxu1 %v4498_v11 }
 0x7c6   : > { %4313 = vmatpush3.msra.mxu1 %v2484_v0 }
 0x7c7   : > { %4339 = vmatprep.subr.mxu1 %v4498_v11 }
 0x877   : > { %v2356_v31 = vpop.f32.mrf.mxu1 }
 0x878   : > { %v2357_v32 = vadd.f32 %v3856_v30, %v2356_v31 }
 0x879   : > { %v4286_v33 = vpop.f32.mrf.mxu1 }
 0x87a   : > { %v2360_v34 = vadd.f32 %v2357_v32, %v4850_v5  ;;  %v2393_v5 = vld [vmem:[%s5361_s17 + $0x10] sm:$0xff]  ;;  %v3869_v33 = vld [vmem:[%s5396_s2 + $0x78] sm:$0xff] }
 0x87b   : > { %4290 = vmatpush3.msra.mxu0 %v2393_v5 }
 0x87c   : > { %v2363_v35 = vsel %vm2192_vm8, %v2360_v34, 0.0  ;;  %4291 = vmatprep.subr.mxu0 %v4498_v11 }
 0x87d   : > { %2364 = vadd.xlane.f32.xlu0 %v2363_v35  ;;  %4292 = vmatpush3.msra.mxu0 %v2392_v42  ;;  %v3868_v35 = vld [vmem:[%s5396_s2 + $0x70] sm:$0xff] }
 0x87e   : > { %4293 = vmatprep.subr.mxu0 %v4498_v11 }
 0x87f   : > { %4294 = vmatpush3.msra.mxu0 %v2391_v43 }
 0x880   : > { %4317 = vmatprep.subr.mxu0 %v4498_v11 }
 0x906   : > { %v2365_v36 = vpop.xlane.xlu0 %2364 }
 0x907   : > { %v2367_v37 = vmul.f32 0.03125, %v2365_v36  ;;  %v3882_v36 = vld [vmem:[%s5396_s2 + $0xb0] sm:$0xff] }
 0x909   : > { %v2368_v38 = vsub.f32 %v2360_v34, %v2367_v37  ;;  %v3883_v34 = vld [vmem:[%s5396_s2 + $0xb8] sm:$0xff]  ;;  %v3867_v37 = vld [vmem:[%s5396_s2 + $0x68] sm:$0xff] }
 0x90b   : > { %v2369_v39 = vmul.f32 %v2368_v38, %v2368_v38 }
 0x90d   : > { %v2370_v40 = vsel %vm2192_vm8, %v2369_v39, 0.0  ;;  %v3866_v39 = vld [vmem:[%s5396_s2 + $0x60] sm:$0xff] }
 0x90e   : > { %2371 = vadd.xlane.f32.xlu1 %v2370_v40  ;;  %v3880_v40 = vld [vmem:[%s5396_s2 + $0xa0] sm:$0xff] }
 0x997   : > { %v2372_v44 = vpop.xlane.xlu1 %2371 }
 0x998   : > { %v2373_v45 = vmul.f32 0.03125, %v2372_v44  ;;  %v3864_v44 = vld [vmem:[%s5365_s21] ss:$0 sm:$0xff] }
 0x99a   : > { %v2374_v46 = vadd.f32 1e-05, %v2373_v45 }
 0x99c   : > { %4470 = vrsqrt.f32 %v2374_v46  ;;  %v3865_v46 = vld [vmem:[%s5366_s22] ss:$0 sm:$0xff] }
 0x9a9   : > { %v4471_v47 = vpop.eup %4470 }
 0x9aa   : > { %v2376_v49 = vmul.f32 %v4471_v47, %v2368_v38  ;;  %v3881_v38 = vld [vmem:[%s5396_s2 + $0xa8] sm:$0xff] }
 0x9ac   : > { %v2383_v51 = vmul.f32 %v3858_v48, %v2376_v49  ;;  %v3876_v49 = vld [vmem:[%s5396_s2 + $0x98] sm:$0xff] }
 0x9ae   : > { %v2390_v52 = vadd.f32 %v3859_v50, %v2383_v51  ;;  %v3875_v50 = vld [vmem:[%s5396_s2 + $0x90] sm:$0xff]  ;;  %v3874_v51 = vld [vmem:[%s5396_s2 + $0x88] sm:$0xff] }
 0x9b0   : > { %4296 = vmatmul.mubr.msk.f32.vlgmr.msra.gmra.mxu0 %vm1079_vm4, %v2390_v52 }
 0x9b1   : > { %4325 = vmatprep.mubr.msk.f32.mxu0 %vm4499_vm2, %v4498_v11  ;;  %4318 = vmatpush3.msra.mxu0 %v3869_v33 }
 0x9b2   : > { %4319 = vmatprep.subr.mxu0 %v4498_v11 }
 0x9b3   : > { %4320 = vmatpush3.msra.mxu0 %v3868_v35 }
 0x9b4   : > { %4321 = vmatprep.subr.mxu0 %v4498_v11 }
 0x9b5   : > { %4322 = vmatpush3.msra.mxu0 %v3867_v37 }
 0x9b6   : > { %4323 = vmatprep.subr.mxu0 %v4498_v11 }
 0x9b7   : > { %4324 = vmatpush3.msra.mxu0 %v3866_v39 }
 0x9b8   : > { %4328 = vmatprep.subr.mxu0 %v4498_v11 }
 0xa70   : > { %v2471_v2 = vpop.f32.mrf.mxu0 }
 0xa71   : > { %v2472_v3 = vadd.f32 %v3860_v1, %v2471_v2 }
 0xa72   : > { %v4297_v4 = vpop.f32.mrf.mxu0 }
 0xa73   : > { %v2475_v6 = vmul.f32 %v2472_v3, %v2472_v3 }
 0xa75   : > { %v2476_v8 = vmul.f32 %v2475_v6, %v2472_v3 }
 0xa77   : > { %v2477_v10 = vmul.f32 0.044715, %v2476_v8 }
 0xa79   : > { %v2478_v12 = vadd.f32 %v2477_v10, %v2472_v3 }
 0xa7b   : > { %v2479_v15 = vmul.f32 0.7978846, %v2478_v12 }
 0xa7d   : > { %4472 = vtanh.f32 %v2479_v15 }
 0xa8a   : > { %v4473_v16 = vpop.eup %4472 }
 0xa8b   : > { %v2481_v17 = vadd.f32 1.0, %v4473_v16 }
 0xa8d   : > { %v2482_v18 = vmul.f32 0.5, %v2481_v17 }
 0xa8f   : > { %v2483_v19 = vmul.f32 %v2482_v18, %v2472_v3 }
 0xa91   : > { %4315 = vmatmul.mubr.msk.f32.vlgmr.msra.gmra.mxu1 %vm2499_vm11, %v2483_v19 }
 0xa92   : > { %4347 = vmatprep.mubr.msk.f32.mxu1 %vm4499_vm2, %v4498_v11  ;;  %4340 = vmatpush3.msra.mxu1 %v3883_v34 }
 0xa93   : > { %4341 = vmatprep.subr.mxu1 %v4498_v11 }
 0xa94   : > { %4342 = vmatpush3.msra.mxu1 %v3882_v36 }
 0xa95   : > { %4343 = vmatprep.subr.mxu1 %v4498_v11 }
 0xa96   : > { %4344 = vmatpush3.msra.mxu1 %v3881_v38 }
 0xa97   : > { %4345 = vmatprep.subr.mxu1 %v4498_v11 }
 0xa98   : > { %4346 = vmatpush3.msra.mxu1 %v3880_v40 }
 0xa99   : > { %4361 = vmatprep.subr.mxu1 %v4498_v11 }
 0xb51   : > { %v2569_v21 = vpop.f32.mrf.mxu1 }
 0xb52   : > { %v2570_v22 = vadd.f32 %v3862_v20, %v2569_v21 }
 0xb53   : > { %v4316_v23 = vpop.f32.mrf.mxu1 }
 0xb54   : > { %v2573_v24 = vadd.f32 %v2570_v22, %v2390_v52  ;;  %v3873_v52 = vld [vmem:[%s5396_s2 + $0x80] sm:$0xff] }
 0xb56   : > { %v2576_v25 = vsel %vm2192_vm8, %v2573_v24, 0.0 }
 0xb57   : > { %2577 = vadd.xlane.f32.xlu1 %v2576_v25 }
 0xbe0   : > { %v2578_v26 = vpop.xlane.xlu1 %2577 }
 0xbe1   : > { %v2579_v29 = vmul.f32 0.03125, %v2578_v26 }
 0xbe3   : > { %v2580_v30 = vsub.f32 %v2573_v24, %v2579_v29 }
 0xbe5   : > { %v2581_v31 = vmul.f32 %v2580_v30, %v2580_v30 }
 0xbe7   : > { %v2582_v32 = vsel %vm2192_vm8, %v2581_v31, 0.0 }
 0xbe8   : > { %2583 = vadd.xlane.f32.xlu1 %v2582_v32 }
 0xc71   : > { %v2584_v41 = vpop.xlane.xlu1 %2583 }
 0xc72   : > { %v2585_v5 = vmul.f32 0.03125, %v2584_v41 }
 0xc74   : > { %v2586_v42 = vadd.f32 1e-05, %v2585_v5 }
 0xc76   : > { %4474 = vrsqrt.f32 %v2586_v42 }
 0xc83   : > { %v4475_v43 = vpop.eup %4474 }
 0xc84   : > { %v2588_v45 = vmul.f32 %v4475_v43, %v2580_v30 }
 0xc86   : > { %v2595_v47 = vmul.f32 %v3864_v44, %v2588_v45 }
 0xc88   : > { %v5125_v48 = vadd.f32 %v3865_v46, %v2595_v47 }
 0xc8a   : > { %4326 = vmatmul.mubr.msk.f32.vlgmr.msra.gmra.mxu0 %vm1079_vm4, %v5125_v48  ;;  %4348 = vmatmul.mubr.msk.f32.vlgmr.msra.gmra.mxu1 %vm1079_vm4, %v5125_v48 }
 0xc8b   : > { %4329 = vmatpush3.msra.mxu0 %v3876_v49  ;;  %4336 = vmatprep.mubr.msk.f32.mxu0 %vm4499_vm2, %v4498_v11 }
 0xc8c   : > { %4330 = vmatprep.subr.mxu0 %v4498_v11  ;;  %4362 = vmatpush3.msra.mxu1 %v4858_v7 }
 0xc8d   : > { %4331 = vmatpush3.msra.mxu0 %v3875_v50  ;;  %4363 = vmatprep.subr.mxu1 %v4498_v11 }
 0xc8e   : > { %4332 = vmatprep.subr.mxu0 %v4498_v11  ;;  %4364 = vmatpush3.msra.mxu1 %v4872_v9 }
 0xc8f   : > { %4333 = vmatpush3.msra.mxu0 %v3874_v51  ;;  %4365 = vmatprep.subr.mxu1 %v4498_v11 }
 0xc90   : > { %4334 = vmatprep.subr.mxu0 %v4498_v11  ;;  %4366 = vmatpush3.msra.mxu1 %v4901_v13 }
 0xc91   : > { %4335 = vmatpush3.msra.mxu0 %v3873_v52  ;;  %4367 = vmatprep.subr.mxu1 %v4498_v11 }
 0xc92   : > { %4337 = vmatmul.mubr.msk.f32.vlgmr.msra.gmra.mxu0 %vm1079_vm4, %v5125_v48  ;;  %4350 = vmatprep.subr.mxu0 %v4498_v11 }
 0xc93   : > { %4351 = vmatpush3.msra.mxu0 %v4858_v7  ;;  %4358 = vmatprep.mubr.msk.f32.mxu0 %vm4499_vm2, %v4498_v11  ;;  %v3871_v7 = vld [vmem:[%s5356_s12 + $0x3] ss:$0 sm:$0xff] }
 0xc94   : > { %4352 = vmatprep.subr.mxu0 %v4498_v11  ;;  %4368 = vmatpush3.msra.mxu1 %v4910_v14 }
 0xc95   : > { %4353 = vmatpush3.msra.mxu0 %v4872_v9  ;;  %4369 = vmatprep.mubr.msk.f32.mxu1 %vm4499_vm2, %v4498_v11  ;;  %v3885_v9 = vld [vmem:[%s5356_s12 + $0x5] ss:$0 sm:$0xff] }
 0xc96   : > { %4354 = vmatprep.subr.mxu0 %v4498_v11  ;;  %4391 = vmatprep.subr.mxu1 %v4498_v11 }
 0xc97   : > { %4355 = vmatpush3.msra.mxu0 %v4901_v13  ;;  %v3878_v13 = vld [vmem:[%s5356_s12 + $0x4] ss:$0 sm:$0xff] }
 0xc98   : > { %4356 = vmatprep.subr.mxu0 %v4498_v11 }
 0xc99   : > { %4357 = vmatpush3.msra.mxu0 %v4910_v14 }
 0xd4a   : > { %v2685_v53 = vpop.f32.mrf.mxu0  ;;  %v2851_v55 = vpop.f32.mrf.mxu1 }
 0xd4b   : > { %v2686_v57 = vadd.f32 %v3871_v7, %v2685_v53  ;;  %v2852_v58 = vadd.f32 %v3885_v9, %v2851_v55  ;;  %v3903_v55 = vld [vmem:[%s5358_s14 + $0x1] ss:$0 sm:$0xff] }
 0xd4c   : > { %v4327_v60 = vpop.f32.mrf.mxu0  ;;  %v4349_v62 = vpop.f32.mrf.mxu1 }
 0xd4d   : > { %4359 = vmatmul.mubr.msk.f32.vlgmr.msra.gmra.mxu0 %vm1079_vm4, %v2686_v57  ;;  %4372 = vmatprep.subr.msk.mxu0 %vm2026_vm6, %v2852_v58  ;;  %v2855_v10 = vmul.f32 %v2686_v57, %v4934_v27 }
 0xd4e   : > { %4373 = vmatpush3.msk.msra.mxu0 %vm2026_vm6, %v2852_v58 }
 0xd4f   : > { %4380 = vmatprep.subr.mxu0 %v4498_v11 }
 0xd52   : > { %v2768_v14 = vpop.f32.mrf.mxu0 }
 0xd53   : > { %v2769_v63 = vadd.f32 %v3878_v13, %v2768_v14 }
 0xd54   : > { %v4338_v0 = vpop.f32.mrf.mxu0 }
 0xd55   : > { %4370 = vmatmul.mubr.msk.f32.vlgmr.msra.gmra.mxu1 %vm1079_vm4, %v2769_v63  ;;  %v2931_v6 = vmul.f32 %v2769_v63, %v4934_v27 }
 0xd56   : > { %4392 = vmatpush3.msra.mxu1 %v4950_v54  ;;  %4399 = vmatprep.mubr.msk.f32.mxu1 %vm4499_vm2, %v4498_v11 }
 0xd57   : > { %4393 = vmatprep.subr.mxu1 %v4498_v11 }
 0xd58   : > { %4394 = vmatpush3.msra.mxu1 %v4956_v56 }
 0xd59   : > { %4395 = vmatprep.subr.mxu1 %v4498_v11 }
 0xd5a   : > { %4396 = vmatpush3.msra.mxu1 %v4963_v59 }
 0xd5b   : > { %4397 = vmatprep.subr.mxu1 %v4498_v11 }
 0xd5c   : > { %4398 = vmatpush3.msra.mxu1 %v4971_v61 }
 0xd5d   : > { %4413 = vmatprep.subr.mxu1 %v4498_v11 }
 0xe0d   : > { %v2925_v1 = vpop.f32.mrf.mxu0 }
 0xe0e   : > { %v2929_v3 = vmul.f32 %v2925_v1, %v4939_v28 }
 0xe0f   : > { %v4360_v2 = vpop.f32.mrf.mxu0 }
 0xe10   : > { %v2930_v16 = vadd.f32 %v2929_v3, %v2855_v10  ;;  %v3912_v3 = vld [vmem:[%s5361_s17 + $0x38] sm:$0xff] }
 0xe12   : > { %v3008_v19 = vmin.f32 %v2930_v16, 0.0  ;;  %vm3007_vm13 = vcmp.gt.f32.partialorder %v2930_v16, 0.0 }
 0xe14   : > { %v3009_v20 = vmul.f32 1.442695, %v3008_v19 }
 0xe15   : > { %v3001_v4 = vpop.f32.mrf.mxu1 }
 0xe16   : > { %v3005_v8 = vmul.f32 %v3001_v4, %v4939_v28  ;;  %v3910_v4 = vld [vmem:[%s5361_s17 + $0x28] sm:$0xff] }
 0xe17   : > { %v4371_v12 = vpop.f32.mrf.mxu1 }
 0xe18   : > { %v3006_v15 = vadd.f32 %v3005_v8, %v2931_v6  ;;  %v3909_v6 = vld [vmem:[%s5361_s17 + $0x20] sm:$0xff] }
 0xe1a   : > { %v3015_v17 = vmin.f32 %v3006_v15, 0.0  ;;  %vm3014_vm12 = vcmp.gt.f32.partialorder %v3006_v15, 0.0 }
 0xe1c   : > { %v3016_v18 = vmul.f32 1.442695, %v3015_v17 }
 0xe1e   : > { %4476 = vpow2.f32 %v3016_v18  ;;  %v3908_v18 = vld [vmem:[%s5360_s16 + $0x1] ss:$0 sm:$0xff] }
 0xe1f   : > { %4478 = vpow2.f32 %v3009_v20 }
 0xe2b   : > { %v4477_v21 = vpop.eup %4476 }
 0xe2c   : > { %v3890_v22 = vadd.f32 -1.0, %v4477_v21  ;;  %v4479_v28 = vpop.eup %4478  ;;  %v3923_v21 = vld [vmem:[%s5363_s19 + $0x78] sm:$0xff] }
 0xe2d   : > { %v3889_v29 = vadd.f32 -1.0, %v4479_v28  ;;  %v3918_v28 = vld [vmem:[%s5363_s19 + $0x50] sm:$0xff] }
 0xe2e   : > { %v3019_v23 = vsel %vm3014_vm12, %v3006_v15, %v3890_v22  ;;  %v3922_v22 = vld [vmem:[%s5363_s19 + $0x70] sm:$0xff] }
 0xe2f   : > { %v3020_v24 = vadd.f32 1.0, %v3019_v23  ;;  %v3012_v32 = vsel %vm3007_vm13, %v2930_v16, %v3889_v29  ;;  %v3907_v16 = vld [vmem:[%s5359_s15 + $0x1] ss:$0 sm:$0xff]  ;;  %v3921_v23 = vld [vmem:[%s5363_s19 + $0x68] sm:$0xff] }
 0xe30   : > { %v3013_v34 = vadd.f32 1.0, %v3012_v32  ;;  %v3914_v29 = vld [vmem:[%s5362_s18 + $0x1] ss:$0 sm:$0xff] }
 0xe31   : > { %3021 = vxpose.xlu1.b32.start.end [1/1] (short) (narrow) %v3020_v24, 32  ;;  %v3230_v25 = vsel %vm2192_vm8, %v3020_v24, 0.0  ;;  %v3920_v24 = vld [vmem:[%s5363_s19 + $0x60] sm:$0xff] }
 0xe32   : > { %v3231_v26 = vrot.slane %v3230_v25, 4 }
 0xe34   : > { %v3232_v27 = vadd.f32 %v3231_v26, %v3230_v25  ;;  %v3919_v25 = vld [vmem:[%s5363_s19 + $0x58] sm:$0xff]  ;;  %v3917_v26 = vld [vmem:[%s5363_s19 + $0x48] sm:$0xff] }
 0xe36   : > { %v3233_v30 = vrot.slane %v3232_v27, 2 }
 0xe38   : > { %v3234_v31 = vadd.f32 %v3233_v30, %v3232_v27  ;;  %v3916_v27 = vld [vmem:[%s5363_s19 + $0x40] sm:$0xff] }
 0xe3a   : > { %v3235_v33 = vrot.slane %v3234_v31, 1 }
 0xe3c   : > { %v3236_v35 = vadd.f32 %v3235_v33, %v3234_v31 }
 0xe3e   : > { %v3237_v36 = vmul.f32 %v3236_v35, %v3013_v34 }
 0xe40   : > { %4400 = vmatmul.mubr.msk.f32.vlgmr.msra.gmra.mxu1 %vm1079_vm4, %v3237_v36 }
 0xe41   : > { %4421 = vmatprep.mubr.msk.f32.mxu1 %vm4499_vm2, %v4498_v11  ;;  %4414 = vmatpush3.msra.mxu1 %v3912_v3  ;;  %v3666_v3 = vld [vmem:[%s5369_s25] sm:$0xff] }
 0xe42   : > { %4415 = vmatprep.subr.mxu1 %v4498_v11 }
 0xead   : > { %v3037_v37 = vpop.trf.xlu1 }
 0xeae   : > { %4374 = vmatprep.mubr.msk.f32.mxu0 %vm2013_vm9, %v3037_v37 }
 0xeb1   : > { %v3038_v38 = vpop.trf.xlu1 }
 0xeb2   : > { %4375 = vmatmul.mubr.msk.f32.vlgmr.msra.gmra.mxu0 %vm2013_vm9, %v3038_v38 }
 0xeb5   : > { %v3039_v39 = vpop.trf.xlu1 }
 0xeb6   : > { %4377 = vmatprep.mubr.msk.f32.mxu0 %vm2013_vm9, %v3039_v39 }
 0xeb9   : > { %v3040_v40 = vpop.trf.xlu1 }
 0xeba   : > { %4378 = vmatmul.mubr.msk.f32.gmra.mxu0 %vm2013_vm9, %v3040_v40 }
 0xebb   : > { %4388 = vmatprep.mubr.msk.f32.mxu0 %vm4499_vm2, %v4498_v11 }
 0xf00   : > { %v3307_v41 = vpop.f32.mrf.mxu1 }
 0xf01   : > { %v3308_v51 = vadd.f32 1e-06, %v3307_v41 }
 0xf02   : > { %v4401_v5 = vpop.f32.mrf.mxu1 }
 0xf03   : > { %4480 = vrcp.f32 %v3308_v51  ;;  %v3925_v5 = vld [vmem:[%s5364_s20 + $0x1] ss:$0 sm:$0xff] }
 0xf10   : > { %v4481_v52 = vpop.eup %4480 }
 0xf72   : > { %v4376_v42 = vpop.f32.mrf.mxu0 }
 0xf73   : > { %v3154_v49 = vmul.f32 %v4376_v42, %v4963_v59  ;;  %v3899_v59 = vld [vmem:[%s5357_s13 + $0x28] sm:$0xff] }
 0xf74   : > { %v3134_v43 = vpop.f32.mrf.mxu0 }
 0xf75   : > { %v3153_v50 = vmul.f32 %v3134_v43, %v4971_v61  ;;  %v3898_v61 = vld [vmem:[%s5357_s13 + $0x20] sm:$0xff] }
 0xf7a   : > { %v4379_v44 = vpop.f32.mrf.mxu0 }
 0xf7b   : > { %v3156_v45 = vmul.f32 %v4379_v44, %v4950_v54  ;;  %v3901_v54 = vld [vmem:[%s5357_s13 + $0x38] sm:$0xff] }
 0xf7c   : > { %v3144_v46 = vpop.f32.mrf.mxu0 }
 0xf7d   : > { %v3155_v47 = vmul.f32 %v3144_v46, %v4956_v56  ;;  %4381 = vmatpush3.msra.mxu0 %v3156_v45  ;;  %v3900_v56 = vld [vmem:[%s5357_s13 + $0x30] sm:$0xff] }
 0xf7e   : > { %4382 = vmatprep.subr.mxu0 %v4498_v11 }
 0xf7f   : > { %4383 = vmatpush3.msra.mxu0 %v3155_v47 }
 0xf80   : > { %4384 = vmatprep.subr.mxu0 %v4498_v11 }
 0xf81   : > { %4385 = vmatpush3.msra.mxu0 %v3154_v49 }
 0xf82   : > { %4386 = vmatprep.subr.mxu0 %v4498_v11 }
 0xf83   : > { %4387 = vmatpush3.msra.mxu0 %v3153_v50 }
 0xf84   : > { %4389 = vmatmul.mubr.msk.f32.vlgmr.msra.gmra.mxu0 %vm1079_vm4, %v3013_v34  ;;  %4402 = vmatprep.subr.mxu0 %v4498_v11 }
 0xf85   : > { %4403 = vmatpush3.msra.mxu0 %v3901_v54  ;;  %4410 = vmatprep.mubr.msk.f32.mxu0 %vm4499_vm2, %v4498_v11 }
 0xf86   : > { %4404 = vmatprep.subr.mxu0 %v4498_v11 }
 0xf87   : > { %4405 = vmatpush3.msra.mxu0 %v3900_v56 }
 0xf88   : > { %4406 = vmatprep.subr.mxu0 %v4498_v11 }
 0xf89   : > { %4407 = vmatpush3.msra.mxu0 %v3899_v59 }
 0xf8a   : > { %4408 = vmatprep.subr.mxu0 %v4498_v11 }
 0xf8b   : > { %4409 = vmatpush3.msra.mxu0 %v3898_v61 }
 0xf8c   : > { %4424 = vmatprep.subr.mxu0 %v4498_v11 }
0x1044   : > { %v3226_v7 = vpop.f32.mrf.mxu0 }
0x1045   : > { %v3312_v9 = vmul.f32 %v4481_v52, %v3226_v7  ;;  %v3929_v7 = vld [vmem:[%s5365_s21 + $0x1] ss:$0 sm:$0xff] }
0x1046   : > { %v4390_v53 = vpop.f32.mrf.mxu0 }
0x1047   : > { %4411 = vmatmul.mubr.msk.f32.vlgmr.msra.gmra.mxu0 %vm1079_vm4, %v3312_v9  ;;  %v3930_v53 = vld [vmem:[%s5366_s22 + $0x1] ss:$0 sm:$0xff] }
0x1048   : > { %4440 = vmatprep.mubr.msk.f32.mxu0 %vm4499_vm2, %v4498_v11  ;;  %4425 = vmatpush3.msra.mxu0 %v3923_v21 }
0x1049   : > { %4426 = vmatprep.subr.mxu0 %v4498_v11 }
0x104a   : > { %4427 = vmatpush3.msra.mxu0 %v3922_v22 }
0x104b   : > { %4428 = vmatprep.subr.mxu0 %v4498_v11 }
0x104c   : > { %4429 = vmatpush3.msra.mxu0 %v3921_v23 }
0x104d   : > { %4430 = vmatprep.subr.mxu0 %v4498_v11 }
0x104e   : > { %4431 = vmatpush3.msra.mxu0 %v3920_v24 }
0x104f   : > { %4432 = vmatprep.subr.mxu0 %v4498_v11 }
0x1050   : > { %4433 = vmatpush3.msra.mxu0 %v3919_v25 }
0x1051   : > { %4434 = vmatprep.subr.mxu0 %v4498_v11 }
0x1052   : > { %4435 = vmatpush3.msra.mxu0 %v3918_v28 }
0x1053   : > { %4436 = vmatprep.subr.mxu0 %v4498_v11 }
0x1054   : > { %4437 = vmatpush3.msra.mxu0 %v3917_v26 }
0x1055   : > { %4438 = vmatprep.subr.mxu0 %v4498_v11 }
0x1056   : > { %4439 = vmatpush3.msra.mxu0 %v3916_v27 }
0x1107   : > { %v3395_v57 = vpop.f32.mrf.mxu0 }
0x1108   : > { %v3396_v58 = vadd.f32 %v3903_v55, %v3395_v57 }
0x1109   : > { %v4412_v60 = vpop.f32.mrf.mxu0 }
0x110a   : > { %v3399_v62 = vadd.f32 %v3396_v58, %v5125_v48  ;;  %v3911_v48 = vld [vmem:[%s5361_s17 + $0x30] sm:$0xff] }
0x110b   : > { %4416 = vmatpush3.msra.mxu1 %v3911_v48 }
0x110c   : > { %v3404_v13 = vsel %vm2192_vm8, %v3399_v62, 0.0  ;;  %4417 = vmatprep.subr.mxu1 %v4498_v11 }
0x110d   : > { %3405 = vadd.xlane.f32.xlu0 %v3404_v13  ;;  %4418 = vmatpush3.msra.mxu1 %v3910_v4 }
0x110e   : > { %4419 = vmatprep.subr.mxu1 %v4498_v11 }
0x110f   : > { %4420 = vmatpush3.msra.mxu1 %v3909_v6 }
0x1110   : > { %4443 = vmatprep.subr.mxu1 %v4498_v11 }
0x1196   : > { %v3406_v14 = vpop.xlane.xlu0 %3405 }
0x1197   : > { %v3407_v63 = vmul.f32 0.03125, %v3406_v14 }
0x1199   : > { %v3408_v0 = vsub.f32 %v3399_v62, %v3407_v63 }
0x119b   : > { %v3409_v1 = vmul.f32 %v3408_v0, %v3408_v0 }
0x119d   : > { %v3410_v2 = vsel %vm2192_vm8, %v3409_v1, 0.0  ;;  %v3668_v1 = vld [vmem:[%s5369_s25 + $0x10] sm:$0xff] }
0x119e   : > { %3411 = vadd.xlane.f32.xlu1 %v3410_v2  ;;  %v3667_v2 = vld [vmem:[%s5369_s25 + $0x8] sm:$0xff] }
0x1227   : > { %v3412_v8 = vpop.xlane.xlu1 %3411 }
0x1228   : > { %v3413_v10 = vmul.f32 0.03125, %v3412_v8 }
0x122a   : > { %v3414_v12 = vadd.f32 1e-05, %v3413_v10  ;;  %v3648_v10 = vld [vmem:[%s5367_s23] sm:$0x1] }
0x122c   : > { %4482 = vrsqrt.f32 %v3414_v12 }
0x1239   : > { %v4483_v15 = vpop.eup %4482 }
0x123a   : > { %v3416_v17 = vmul.f32 %v4483_v15, %v3408_v0  ;;  %v3669_v0 = vld [vmem:[%s5369_s25 + $0x18] sm:$0xff]  ;;  %v3649_v15 = vld [vmem:[%s5368_s24] sm:$0x1] }
0x123c   : > { %v3423_v19 = vmul.f32 %v3907_v16, %v3416_v17 }
0x123e   : > { %v3430_v20 = vadd.f32 %v3908_v18, %v3423_v19 }
0x1240   : > { %4422 = vmatmul.mubr.msk.f32.vlgmr.msra.gmra.mxu1 %vm1079_vm4, %v3430_v20 }
0x1241   : > { %4451 = vmatprep.mubr.msk.f32.mxu1 %vm4499_vm2, %v4498_v11  ;;  %4444 = vmatpush3.msra.mxu1 %v3669_v0 }
0x1242   : > { %4445 = vmatprep.subr.mxu1 %v4498_v11 }
0x1243   : > { %4446 = vmatpush3.msra.mxu1 %v3668_v1 }
0x1244   : > { %4447 = vmatprep.subr.mxu1 %v4498_v11 }
0x1245   : > { %4448 = vmatpush3.msra.mxu1 %v3667_v2 }
0x1246   : > { %4449 = vmatprep.subr.mxu1 %v4498_v11  ;;  %v3670_v11 = vld [vmem:[#allocation2] sm:$0x1] }
0x1247   : > { %4450 = vmatpush3.msra.mxu1 %v3666_v3 }
0x1300   : > { %v3513_v30 = vpop.f32.mrf.mxu1 }
0x1301   : > { %v3514_v31 = vadd.f32 %v3914_v29, %v3513_v30 }
0x1302   : > { %v4423_v32 = vpop.f32.mrf.mxu1 }
0x1303   : > { %v3517_v33 = vmul.f32 %v3514_v31, %v3514_v31 }
0x1305   : > { %v3518_v34 = vmul.f32 %v3517_v33, %v3514_v31 }
0x1307   : > { %v3519_v35 = vmul.f32 0.044715, %v3518_v34 }
0x1309   : > { %v3520_v36 = vadd.f32 %v3519_v35, %v3514_v31 }
0x130b   : > { %v3521_v37 = vmul.f32 0.7978846, %v3520_v36 }
0x130d   : > { %4484 = vtanh.f32 %v3521_v37 }
0x131a   : > { %v4485_v38 = vpop.eup %4484 }
0x131b   : > { %v3523_v39 = vadd.f32 1.0, %v4485_v38 }
0x131d   : > { %v3524_v40 = vmul.f32 0.5, %v3523_v39 }
0x131f   : > { %v3525_v41 = vmul.f32 %v3524_v40, %v3514_v31 }
0x1321   : > { %4441 = vmatmul.mubr.msk.f32.vlgmr.msra.gmra.mxu0 %vm2499_vm11, %v3525_v41 }
0x13e1   : > { %v3612_v42 = vpop.f32.mrf.mxu0 }
0x13e2   : > { %v3613_v43 = vadd.f32 %v3925_v5, %v3612_v42 }
0x13e3   : > { %v4442_v44 = vpop.f32.mrf.mxu0 }
0x13e4   : > { %v3616_v45 = vadd.f32 %v3613_v43, %v3430_v20 }
0x13e6   : > { %v3621_v46 = vsel %vm2192_vm8, %v3616_v45, 0.0 }
0x13e7   : > { %3622 = vadd.xlane.f32.xlu0 %v3621_v46 }
0x1470   : > { %v3623_v47 = vpop.xlane.xlu0 %3622 }
0x1471   : > { %v3624_v49 = vmul.f32 0.03125, %v3623_v47 }
0x1473   : > { %v3625_v50 = vsub.f32 %v3616_v45, %v3624_v49 }
0x1475   : > { %v3626_v54 = vmul.f32 %v3625_v50, %v3625_v50 }
0x1477   : > { %v3627_v56 = vsel %vm2192_vm8, %v3626_v54, 0.0 }
0x1478   : > { %3628 = vadd.xlane.f32.xlu0 %v3627_v56 }
0x1501   : > { %v3629_v59 = vpop.xlane.xlu0 %3628 }
0x1502   : > { %v3630_v61 = vmul.f32 0.03125, %v3629_v59 }
0x1504   : > { %v3631_v51 = vadd.f32 1e-05, %v3630_v61 }
0x1506   : > { %4486 = vrsqrt.f32 %v3631_v51 }
0x1513   : > { %v4487_v52 = vpop.eup %4486 }
0x1514   : > { %v3633_v9 = vmul.f32 %v4487_v52, %v3625_v50 }
0x1516   : > { %v3640_v55 = vmul.f32 %v3929_v7, %v3633_v9 }
0x1518   : > { %v3647_v57 = vadd.f32 %v3930_v53, %v3640_v55 }
0x151a   : > { %v3651_v58 = vsel %vm3650_vm14, %v3647_v57, 0.0 }
0x151b   : > { %3652 = vadd.xlane.f32.xlu0 %v3651_v58 }
0x15a4   : > { %v3653_v60 = vpop.xlane.xlu0 %3652 }
0x15a5   : > { %v3654_v62 = vmul.f32 0.03125, %v3653_v60 }
0x15a7   : > { %v3655_v13 = vsub.f32 %v3647_v57, %v3654_v62 }
0x15a9   : > { %v3656_v14 = vmul.f32 %v3655_v13, %v3655_v13 }
0x15ab   : > { %v3657_v63 = vsel %vm3650_vm14, %v3656_v14, 0.0 }
0x15ac   : > { %3658 = vadd.xlane.f32.xlu0 %v3657_v63 }
0x1635   : > { %v3659_v48 = vpop.xlane.xlu0 %3658 }
0x1636   : > { %v3660_v4 = vmul.f32 0.03125, %v3659_v48 }
0x1638   : > { %v3661_v6 = vadd.f32 1e-05, %v3660_v4 }
0x163a   : > { %4488 = vrsqrt.f32 %v3661_v6 }
0x1647   : > { %v4489_v8 = vpop.eup %4488 }
0x1648   : > { %v3663_v12 = vmul.f32 %v4489_v8, %v3655_v13 }
0x164a   : > { %v3664_v16 = vmul.f32 %v3663_v12, %v3648_v10 }
0x164c   : > { %v3665_v17 = vadd.f32 %v3664_v16, %v3649_v15 }
0x164e   : > { %4452 = vmatmul.mubr.msk.f32.vlgmr.msra.gmra.mxu1 %vm1079_vm4, %v3665_v17 }
0x170e   : > { %v3740_v18 = vpop.f32.mrf.mxu1 }
0x170f   : > { %v3741_v19 = vadd.f32 %v3740_v18, %v3670_v11 }
0x1710   : > { %v4453_v20 = vpop.f32.mrf.mxu1 }
0x1711   : > { %3745 = vst.msk [vmem:[%s816_s1] sm:$0x1] %vm3744_vm15, %v3741_v19 }
0x1712 PF: > { %s39_s8 = sadd.s32 1, %s4496_s8  }
0x1713   : > { %p36_p4 = scmp.ge.s32.totalorder %s39_s8, 4  }
0x1715   :  { %38 = sbr.rel (!%p36_p4) target bundleno = 13 (0xd), region = 184 }

</bundles_post_ra>
